<compile_context>
chip_gen: v5e
topology: v5e:2x2
jax: 0.10.0
libtpu: 0.0.40
codegen_flags: <defaults>
</compile_context>

<pallas_src>
import functools

import jax
import jax.numpy as jnp
from jax.experimental import pallas as pl
from jax.experimental.pallas import tpu as pltpu


def nrms_kernel(x_ref, w1_ref, b1_ref, w2c_ref, b2c_ref,
                wa_ref, ba_ref, qa_ref,
                out_ref, att_ref, *, Hp, H, Np, N, heads, dh):
    """One grid step processes TB batch elements entirely in VMEM.

    x_ref    : (TB, Hp+Np, F)  history + candidate doc-vectors (+ pad rows),
               already in compute dtype
    w2c_ref  : (U, 4*D)  newsencoder output layer with folded Q/K/V projection
               -> columns are [enc | q | k | v]
    qa_ref   : (1, A)    additive-attention query (row form)
    out_ref  : (TB, Np)  softmax scores (pad candidates are exact zeros)
    att_ref  : (TB, Hp, D) f32 VMEM scratch holding the multi-head output
    """
    f32 = jnp.float32
    TB, HNp, F = x_ref.shape
    D = heads * dh
    A = wa_ref.shape[1]
    wdt = w1_ref.dtype                      # MXU operand dtype (bf16 or f32)
    rows = TB * HNp
    neg = jnp.float32(-1e30)

    # ---- news encoder + fused Q/K/V in two MXU-filling matmuls -------------
    x2 = x_ref[...].reshape(rows, F)                          # already wdt
    h1 = jnp.dot(x2, w1_ref[...], preferred_element_type=f32) + b1_ref[...]
    h1 = jnp.maximum(h1, 0.0)
    big = (jnp.dot(h1.astype(wdt), w2c_ref[...], preferred_element_type=f32)
           + b2c_ref[...])                                    # (rows, 4*D)
    big3 = big.reshape(TB, HNp, 4 * D)

    news_enc = big3[:, Hp:Hp + Np, :D]                        # (TB, Np, D)

    # ---- multi-head self-attention over history, batched over TB -----------
    scale = 1.0 / float(dh) ** 0.5
    for h in range(heads):                                    # static unroll
        q_h = big3[:, :Hp, D + h * dh:D + (h + 1) * dh].astype(wdt)
        k_h = big3[:, :Hp, 2 * D + h * dh:2 * D + (h + 1) * dh].astype(wdt)
        v_h = big3[:, :Hp, 3 * D + h * dh:3 * D + (h + 1) * dh].astype(wdt)
        logits = jnp.einsum('bid,bjd->bij', q_h, k_h,
                            preferred_element_type=f32) * scale
        if Hp > H:  # structural pad rows: mask their key columns
            kmask = jax.lax.broadcasted_iota(jnp.int32, (1, 1, Hp), 2) < H
            logits = jnp.where(kmask, logits, neg)
        logits = logits - jnp.max(logits, axis=-1, keepdims=True)
        p = jnp.exp(logits)
        p = p * pl.reciprocal(jnp.sum(p, axis=-1, keepdims=True), approx=True)
        att_ref[:, :, h * dh:(h + 1) * dh] = jnp.einsum(
            'bij,bjd->bid', p.astype(wdt), v_h, preferred_element_type=f32)

    att = att_ref[...]                                        # (TB, Hp, D) f32

    # ---- additive-attention pooling over the history axis ------------------
    e2 = jnp.tanh(jnp.dot(att.reshape(TB * Hp, D).astype(wdt), wa_ref[...],
                          preferred_element_type=f32) + ba_ref[...])
    s = jnp.sum(e2.reshape(TB, Hp, A) * qa_ref[...], axis=-1)  # (TB, Hp)
    if Hp > H:  # structural pad history rows get zero pooling weight
        rmask = jax.lax.broadcasted_iota(jnp.int32, (1, Hp), 1) < H
        s = jnp.where(rmask, s, neg)
    s = s - jnp.max(s, axis=-1, keepdims=True)
    w = jnp.exp(s)
    w = w * pl.reciprocal(jnp.sum(w, axis=-1, keepdims=True), approx=True)
    user = jnp.sum(w[:, :, None] * att, axis=1)               # (TB, D)

    # ---- scoring (bmm equivalent) + exact softmax over candidates ----------
    scores = jnp.sum(news_enc * user[:, None, :], axis=-1)    # (TB, Np)
    if Np > N:  # structural pad candidates -> exp() underflows to exactly 0
        cmask = jax.lax.broadcasted_iota(jnp.int32, (1, Np), 1) < N
        scores = jnp.where(cmask, scores, neg)
    scores = scores - jnp.max(scores, axis=-1, keepdims=True)
    p = jnp.exp(scores)
    p = p / jnp.sum(p, axis=-1, keepdims=True)   # exact normalization
    out_ref[...] = p.astype(out_ref.dtype)


def _pick_batch_tile(B, items_per_batch, bytes_per_batch_elem, *,
                     target_rows=2048, min_steps=2, vmem_target=40 << 20):
    """Largest batch tile that (a) divides B, (b) keeps the output block
    sublane-aligned (multiple of 8, or the whole batch), (c) gives roughly
    `target_rows` newsencoder rows per grid step, (d) fits a conservative
    VMEM target (safe on v7x's 64 MiB), and (e) leaves >= min_steps grid
    steps when B allows it, so the "parallel" axis can shard across v7x's
    two TensorCores and the x-slab DMA is double-buffered."""
    cap = min(B,
              max(1, target_rows // max(1, items_per_batch)),
              max(1, vmem_target // max(1, bytes_per_batch_elem)))
    if min_steps > 1:
        cap = min(cap, max(1, B // min_steps))
    for tb in range(max(1, cap), 0, -1):
        if B % tb == 0 and (tb % 8 == 0 or tb == B):
            return tb
    return B


def _vmem_limit_bytes(TB, HNp, F, U, D, A, Np, x_bytes, w_bytes):
    """Explicit scoped-VMEM request: double-buffered x block + weights +
    output blocks + att scratch + f32 intermediates, with headroom, clamped
    to a window that is safe on every generation (v7x: 64 MiB physical)."""
    rows = TB * HNp
    need = 2 * TB * HNp * F * x_bytes                     # x (double-buffered)
    need += 2 * (F * U + U * 4 * D + D * A) * w_bytes     # weights
    need += 2 * (U + 4 * D + 2 * A) * 4                   # biases / query
    need += 2 * TB * Np * 4                               # output blocks
    need += TB * HNp * D * 4                              # att scratch
    need += rows * (U + 4 * D) * 4 * 3                    # f32 intermediates
    need = int(need * 1.5) + (2 << 20)
    return max(24 << 20, min(need, 56 << 20))


def nrms_forward(his, pred, params, *, compute_dtype=jnp.bfloat16,
                 batch_tile=None):
    B, H, F = his.shape
    _, N, _ = pred.shape
    heads, D, dh = params["wq"].shape
    U = params["w1"].shape[1]
    A = params["wa"].shape[1]
    f32 = jnp.float32

    # --- host-side packing (layout plumbing, done once) ---------------------
    def _flat(wh):                        # (heads, D, dh) -> (D, heads*dh)
        return jnp.transpose(wh, (1, 0, 2)).reshape(D, heads * dh)

    wqkv = jnp.concatenate(
        [_flat(params["wq"]), _flat(params["wk"]), _flat(params["wv"])],
        axis=1).astype(f32)                                  # (D, 3*D)
    w2 = params["w2"].astype(f32)
    b2 = params["b2"].astype(f32)
    # Fold the per-head Q/K/V projection into the newsencoder output layer:
    # enc2 @ wqkv == h1 @ (w2 @ wqkv) + b2 @ wqkv, so one (U, 4*D) matmul
    # in-kernel yields [enc | q | k | v] with a lane-dense output.
    w2cat = jnp.concatenate([w2, w2 @ wqkv], axis=1).astype(compute_dtype)
    b2cat = jnp.concatenate([b2, b2 @ wqkv], axis=1).astype(f32)   # (1, 4*D)

    w1 = params["w1"].astype(compute_dtype)
    b1 = params["b1"].astype(f32)
    wa = params["wa"].astype(compute_dtype)
    ba = params["ba"].astype(f32)
    qa = params["qa"].reshape(1, A).astype(f32)

    # Pad history and candidate axes to sublane multiples *separately* so all
    # in-kernel item-axis slices are (8,.)-aligned for any H / N; structural
    # pad rows are masked inside the kernel.
    Hp = -(-H // 8) * 8
    Np = -(-N // 8) * 8
    pieces = [his]
    if Hp > H:
        pieces.append(jnp.zeros((B, Hp - H, F), his.dtype))
    pieces.append(pred)
    if Np > N:
        pieces.append(jnp.zeros((B, Np - N, F), pred.dtype))
    # Ship the slab in compute dtype: halves the only B-scaled HBM stream
    # (and the x double-buffer VMEM footprint) on the bf16 path.
    x = jnp.concatenate(pieces, axis=1).astype(compute_dtype)   # (B, HNp, F)
    HNp = Hp + Np

    x_bytes = jnp.dtype(compute_dtype).itemsize
    bytes_per_b = HNp * (2 * F * x_bytes + (U + 4 * D) * 4 * 3 + D * 4)
    TB = batch_tile or _pick_batch_tile(B, HNp, bytes_per_b)
    grid = (B // TB,)

    vmem_limit = _vmem_limit_bytes(TB, HNp, F, U, D, A, Np,
                                   x_bytes, x_bytes)

    kernel = functools.partial(nrms_kernel, Hp=Hp, H=H, Np=Np, N=N,
                               heads=heads, dh=dh)

    out = pl.pallas_call(
        kernel,
        out_shape=jax.ShapeDtypeStruct((B, Np), f32),
        grid=grid,
        in_specs=[
            pl.BlockSpec((TB, HNp, F), lambda b: (b, 0, 0)),     # docvec slab
            pl.BlockSpec((F, U), lambda b: (0, 0)),              # newsenc W1
            pl.BlockSpec((1, U), lambda b: (0, 0)),              # newsenc b1
            pl.BlockSpec((U, 4 * D), lambda b: (0, 0)),          # W2 | QKV
            pl.BlockSpec((1, 4 * D), lambda b: (0, 0)),          # b2 | bQKV
            pl.BlockSpec((D, A), lambda b: (0, 0)),              # additive W
            pl.BlockSpec((1, A), lambda b: (0, 0)),              # additive b
            pl.BlockSpec((1, A), lambda b: (0, 0)),              # additive q
        ],
        out_specs=pl.BlockSpec((TB, Np), lambda b: (b, 0)),
        scratch_shapes=[pltpu.VMEM((TB, Hp, heads * dh), f32)],
        compiler_params=pltpu.CompilerParams(
            dimension_semantics=("parallel",),
            vmem_limit_bytes=vmem_limit),
    )(x, w1, b1, w2cat, b2cat, wa, ba, qa)

    return out[:, :N]     # drop structural pad candidates (exact zeros)


# -------------------------- pure-JAX reference ----------------------------- #
def nrms_reference(his, pred, params):
    def newsenc(x):
        h = jnp.maximum(x @ params["w1"] + params["b1"], 0.0)
        return h @ params["w2"] + params["b2"]

    B, H, F = his.shape
    _, N, _ = pred.shape
    his_enc = newsenc(his.reshape(B * H, F)).reshape(B, H, -1)
    heads, _, dh = params["wq"].shape

    outs = []
    for h in range(heads):
        q = his_enc @ params["wq"][h]
        k = his_enc @ params["wk"][h]
        v = his_enc @ params["wv"][h]
        a = jax.nn.softmax((q @ jnp.swapaxes(k, -1, -2)) / (dh ** 0.5), axis=-1)
        outs.append(a @ v)
    att = jnp.concatenate(outs, axis=-1)                        # (B, H, D)

    e = jnp.tanh(att @ params["wa"] + params["ba"]) @ params["qa"]  # (B, H, 1)
    w = jax.nn.softmax(e, axis=1)
    user = jnp.sum(w * att, axis=1)                             # (B, D)

    news = newsenc(pred.reshape(B * N, F)).reshape(B, N, -1)    # (B, N, D)
    scores = jnp.einsum("bnd,bd->bn", news, user)
    return jax.nn.softmax(scores, axis=-1)


if __name__ == "__main__":
    B, H, N = 16, 8, 5         # batch, history length, candidate count
    F, U = 32, 32              # docvec dim, newsencoder hidden units
    heads, dh = 2, 16
    D = heads * dh             # news/user embedding dim
    A = 32                     # additive attention hidden dim

    key = jax.random.PRNGKey(0)
    ks = jax.random.split(key, 12)

    his_input_title = jax.random.normal(ks[0], (B, H, F), jnp.float32)
    pred_input_title = jax.random.normal(ks[1], (B, N, F), jnp.float32)

    params = {
        "w1": jax.random.normal(ks[2], (F, U), jnp.float32) * 0.1,
        "b1": jax.random.normal(ks[3], (1, U), jnp.float32) * 0.01,
        "w2": jax.random.normal(ks[4], (U, D), jnp.float32) * 0.1,
        "b2": jax.random.normal(ks[5], (1, D), jnp.float32) * 0.01,
        "wq": jax.random.normal(ks[6], (heads, D, dh), jnp.float32) * 0.1,
        "wk": jax.random.normal(ks[7], (heads, D, dh), jnp.float32) * 0.1,
        "wv": jax.random.normal(ks[8], (heads, D, dh), jnp.float32) * 0.1,
        "wa": jax.random.normal(ks[9], (D, A), jnp.float32) * 0.1,
        "ba": jax.random.normal(ks[10], (1, A), jnp.float32) * 0.01,
        "qa": jax.random.normal(ks[11], (A, 1), jnp.float32) * 0.1,
    }

    fwd_bf16 = jax.jit(lambda h, p, prm: nrms_forward(
        h, p, prm, compute_dtype=jnp.bfloat16))
    fwd_f32 = jax.jit(lambda h, p, prm: nrms_forward(
        h, p, prm, compute_dtype=jnp.float32))

    preds = jax.block_until_ready(
        fwd_bf16(his_input_title, pred_input_title, params))
    preds_f32 = jax.block_until_ready(
        fwd_f32(his_input_title, pred_input_title, params))
    ref = jax.block_until_ready(
        nrms_reference(his_input_title, pred_input_title, params))

    assert preds.shape == (B, N)
    # final softmax uses an exact divide -> rows sum to 1 to f32 rounding
    assert jnp.allclose(jnp.sum(preds, axis=-1), 1.0, atol=1e-3)
    # exact-semantics path (f32 MXU operands): tight tolerance vs. reference
    assert jnp.allclose(preds_f32, ref, atol=2e-3, rtol=2e-3)
    # fast path (bf16 MXU operands + bf16 input slab, f32 accumulation)
    assert jnp.allclose(preds, ref, atol=2e-2, rtol=2e-2)
    print("KERNEL_OK")
</pallas_src>

<mosaic_0001>
module attributes {stable_mosaic.version = 11 : i64} {
  func.func @nrms_kernel(%arg0: i32, %arg1: memref<8x16x32xbf16, #tpu.memory_space<vmem>>, %arg2: memref<32x32xbf16, #tpu.memory_space<vmem>>, %arg3: memref<1x32xf32, #tpu.memory_space<vmem>>, %arg4: memref<32x128xbf16, #tpu.memory_space<vmem>>, %arg5: memref<1x128xf32, #tpu.memory_space<vmem>>, %arg6: memref<32x32xbf16, #tpu.memory_space<vmem>>, %arg7: memref<1x32xf32, #tpu.memory_space<vmem>>, %arg8: memref<1x32xf32, #tpu.memory_space<vmem>>, %arg9: memref<8x8xf32, #tpu.memory_space<vmem>>, %arg10: memref<8x8x32xf32, #tpu.memory_space<vmem>>) attributes {dimension_semantics = [#tpu.dimension_semantics<parallel>], iteration_bounds = array<i64: 2>, scalar_prefetch = 0 : i64, scratch_operands = 1 : i64, tpu.core_type = #tpu.core_type<tc>, window_params = [{transform_indices = @transform_0, window_bounds = array<i64: 8, 16, 32>}, {pipeline_mode = #tpu.pipeline_mode<synchronous>, transform_indices = @transform_1, window_bounds = array<i64: 32, 32>}, {pipeline_mode = #tpu.pipeline_mode<synchronous>, transform_indices = @transform_2, window_bounds = array<i64: 1, 32>}, {pipeline_mode = #tpu.pipeline_mode<synchronous>, transform_indices = @transform_3, window_bounds = array<i64: 32, 128>}, {pipeline_mode = #tpu.pipeline_mode<synchronous>, transform_indices = @transform_4, window_bounds = array<i64: 1, 128>}, {pipeline_mode = #tpu.pipeline_mode<synchronous>, transform_indices = @transform_5, window_bounds = array<i64: 32, 32>}, {pipeline_mode = #tpu.pipeline_mode<synchronous>, transform_indices = @transform_6, window_bounds = array<i64: 1, 32>}, {pipeline_mode = #tpu.pipeline_mode<synchronous>, transform_indices = @transform_7, window_bounds = array<i64: 1, 32>}, {transform_indices = @transform_8, window_bounds = array<i64: 8, 8>}]} {
    %c0 = arith.constant 0 : index
    %c0_0 = arith.constant 0 : index
    %c0_1 = arith.constant 0 : index
    %0 = vector.load %arg1[%c0, %c0_0, %c0_1] : memref<8x16x32xbf16, #tpu.memory_space<vmem>>, vector<8x16x32xbf16>
    %1 = vector.shape_cast %0 : vector<8x16x32xbf16> to vector<128x32xbf16>
    %c0_2 = arith.constant 0 : index
    %c0_3 = arith.constant 0 : index
    %2 = vector.load %arg2[%c0_2, %c0_3] : memref<32x32xbf16, #tpu.memory_space<vmem>>, vector<32x32xbf16>
    %cst = arith.constant dense<0.000000e+00> : vector<128x32xf32>
    %3 = tpu.matmul %1, %2, %cst {dimension_numbers = #tpu.dot_dimension_numbers<[1], [0], [0], [1], [0, 0, 1, 1], [], []>} : vector<128x32xbf16>, vector<32x32xbf16>, vector<128x32xf32> -> vector<128x32xf32>
    %c0_4 = arith.constant 0 : index
    %c0_5 = arith.constant 0 : index
    %4 = vector.load %arg3[%c0_4, %c0_5] : memref<1x32xf32, #tpu.memory_space<vmem>>, vector<1x32xf32>
    %5 = vector.broadcast %4 : vector<1x32xf32> to vector<128x32xf32>
    %6 = arith.addf %3, %5 : vector<128x32xf32>
    %cst_6 = arith.constant 0.000000e+00 : f32
    %7 = vector.broadcast %cst_6 : f32 to vector<128x32xf32>
    %8 = arith.maximumf %6, %7 : vector<128x32xf32>
    %9 = arith.truncf %8 : vector<128x32xf32> to vector<128x32xbf16>
    %c0_7 = arith.constant 0 : index
    %c0_8 = arith.constant 0 : index
    %10 = vector.load %arg4[%c0_7, %c0_8] : memref<32x128xbf16, #tpu.memory_space<vmem>>, vector<32x128xbf16>
    %cst_9 = arith.constant dense<0.000000e+00> : vector<128x128xf32>
    %11 = tpu.matmul %9, %10, %cst_9 {dimension_numbers = #tpu.dot_dimension_numbers<[1], [0], [0], [1], [0, 0, 1, 1], [], []>} : vector<128x32xbf16>, vector<32x128xbf16>, vector<128x128xf32> -> vector<128x128xf32>
    %c0_10 = arith.constant 0 : index
    %c0_11 = arith.constant 0 : index
    %12 = vector.load %arg5[%c0_10, %c0_11] : memref<1x128xf32, #tpu.memory_space<vmem>>, vector<1x128xf32>
    %13 = vector.broadcast %12 : vector<1x128xf32> to vector<128x128xf32>
    %14 = arith.addf %11, %13 : vector<128x128xf32>
    %15 = vector.shape_cast %14 : vector<128x128xf32> to vector<8x16x128xf32>
    %16 = vector.extract_strided_slice %15 {offsets = [0, 8, 0], sizes = [8, 8, 32], strides = [1, 1, 1]} : vector<8x16x128xf32> to vector<8x8x32xf32>
    %17 = vector.extract_strided_slice %15 {offsets = [0, 0, 32], sizes = [8, 8, 16], strides = [1, 1, 1]} : vector<8x16x128xf32> to vector<8x8x16xf32>
    %18 = arith.truncf %17 : vector<8x8x16xf32> to vector<8x8x16xbf16>
    %19 = vector.extract_strided_slice %15 {offsets = [0, 0, 64], sizes = [8, 8, 16], strides = [1, 1, 1]} : vector<8x16x128xf32> to vector<8x8x16xf32>
    %20 = arith.truncf %19 : vector<8x8x16xf32> to vector<8x8x16xbf16>
    %21 = vector.extract_strided_slice %15 {offsets = [0, 0, 96], sizes = [8, 8, 16], strides = [1, 1, 1]} : vector<8x16x128xf32> to vector<8x8x16xf32>
    %22 = arith.truncf %21 : vector<8x8x16xf32> to vector<8x8x16xbf16>
    "tpu.trace_start"() <{level = 10 : i32, message = "bid,bjd->bij"}> : () -> ()
    %cst_12 = arith.constant dense<0.000000e+00> : vector<8x8x8xf32>
    %23 = tpu.matmul %18, %20, %cst_12 {dimension_numbers = #tpu.dot_dimension_numbers<[2], [2], [1], [1], [0, 0, 0, 1, 1, 1], [0], [0]>} : vector<8x8x16xbf16>, vector<8x8x16xbf16>, vector<8x8x8xf32> -> vector<8x8x8xf32>
    "tpu.trace_stop"() : () -> ()
    %cst_13 = arith.constant 2.500000e-01 : f32
    %24 = vector.broadcast %cst_13 : f32 to vector<8x8x8xf32>
    %25 = arith.mulf %23, %24 : vector<8x8x8xf32>
    %cst_14 = arith.constant dense<0xFF800000> : vector<8x8xf32>
    %26 = vector.multi_reduction <maximumf>, %25, %cst_14 [2] : vector<8x8x8xf32> to vector<8x8xf32>
    %27 = vector.shape_cast %26 : vector<8x8xf32> to vector<8x8x1xf32>
    %28 = vector.broadcast %27 : vector<8x8x1xf32> to vector<8x8x8xf32>
    %29 = arith.subf %25, %28 : vector<8x8x8xf32>
    %30 = math.exp %29 : vector<8x8x8xf32>
    %cst_15 = arith.constant dense<0.000000e+00> : vector<8x8xf32>
    %31 = vector.multi_reduction <add>, %30, %cst_15 [2] : vector<8x8x8xf32> to vector<8x8xf32>
    %32 = vector.shape_cast %31 : vector<8x8xf32> to vector<8x8x1xf32>
    %33 = tpu.reciprocal %32 {approx = true} : vector<8x8x1xf32> -> vector<8x8x1xf32>
    %34 = vector.broadcast %33 : vector<8x8x1xf32> to vector<8x8x8xf32>
    %35 = arith.mulf %30, %34 : vector<8x8x8xf32>
    %36 = arith.truncf %35 : vector<8x8x8xf32> to vector<8x8x8xbf16>
    "tpu.trace_start"() <{level = 10 : i32, message = "bij,bjd->bid"}> : () -> ()
    %cst_16 = arith.constant dense<0.000000e+00> : vector<8x8x16xf32>
    %37 = tpu.matmul %36, %22, %cst_16 {dimension_numbers = #tpu.dot_dimension_numbers<[2], [1], [1], [2], [0, 0, 0, 1, 1, 2], [0], [0]>} : vector<8x8x8xbf16>, vector<8x8x16xbf16>, vector<8x8x16xf32> -> vector<8x8x16xf32>
    "tpu.trace_stop"() : () -> ()
    %c0_17 = arith.constant 0 : index
    %c0_18 = arith.constant 0 : index
    %c0_19 = arith.constant 0 : index
    %38 = vector.load %arg10[%c0_17, %c0_18, %c0_19] : memref<8x8x32xf32, #tpu.memory_space<vmem>>, vector<8x8x16xf32>
    tpu.vector_store %arg10[%c0_17, %c0_18, %c0_19], %37 {strides = array<i32>} : memref<8x8x32xf32, #tpu.memory_space<vmem>>, vector<8x8x16xf32>,
    %39 = vector.extract_strided_slice %15 {offsets = [0, 0, 48], sizes = [8, 8, 16], strides = [1, 1, 1]} : vector<8x16x128xf32> to vector<8x8x16xf32>
    %40 = arith.truncf %39 : vector<8x8x16xf32> to vector<8x8x16xbf16>
    %41 = vector.extract_strided_slice %15 {offsets = [0, 0, 80], sizes = [8, 8, 16], strides = [1, 1, 1]} : vector<8x16x128xf32> to vector<8x8x16xf32>
    %42 = arith.truncf %41 : vector<8x8x16xf32> to vector<8x8x16xbf16>
    %43 = vector.extract_strided_slice %15 {offsets = [0, 0, 112], sizes = [8, 8, 16], strides = [1, 1, 1]} : vector<8x16x128xf32> to vector<8x8x16xf32>
    %44 = arith.truncf %43 : vector<8x8x16xf32> to vector<8x8x16xbf16>
    "tpu.trace_start"() <{level = 10 : i32, message = "bid,bjd->bij"}> : () -> ()
    %cst_20 = arith.constant dense<0.000000e+00> : vector<8x8x8xf32>
    %45 = tpu.matmul %40, %42, %cst_20 {dimension_numbers = #tpu.dot_dimension_numbers<[2], [2], [1], [1], [0, 0, 0, 1, 1, 1], [0], [0]>} : vector<8x8x16xbf16>, vector<8x8x16xbf16>, vector<8x8x8xf32> -> vector<8x8x8xf32>
    "tpu.trace_stop"() : () -> ()
    %cst_21 = arith.constant 2.500000e-01 : f32
    %46 = vector.broadcast %cst_21 : f32 to vector<8x8x8xf32>
    %47 = arith.mulf %45, %46 : vector<8x8x8xf32>
    %cst_22 = arith.constant dense<0xFF800000> : vector<8x8xf32>
    %48 = vector.multi_reduction <maximumf>, %47, %cst_22 [2] : vector<8x8x8xf32> to vector<8x8xf32>
    %49 = vector.shape_cast %48 : vector<8x8xf32> to vector<8x8x1xf32>
    %50 = vector.broadcast %49 : vector<8x8x1xf32> to vector<8x8x8xf32>
    %51 = arith.subf %47, %50 : vector<8x8x8xf32>
    %52 = math.exp %51 : vector<8x8x8xf32>
    %cst_23 = arith.constant dense<0.000000e+00> : vector<8x8xf32>
    %53 = vector.multi_reduction <add>, %52, %cst_23 [2] : vector<8x8x8xf32> to vector<8x8xf32>
    %54 = vector.shape_cast %53 : vector<8x8xf32> to vector<8x8x1xf32>
    %55 = tpu.reciprocal %54 {approx = true} : vector<8x8x1xf32> -> vector<8x8x1xf32>
    %56 = vector.broadcast %55 : vector<8x8x1xf32> to vector<8x8x8xf32>
    %57 = arith.mulf %52, %56 : vector<8x8x8xf32>
    %58 = arith.truncf %57 : vector<8x8x8xf32> to vector<8x8x8xbf16>
    "tpu.trace_start"() <{level = 10 : i32, message = "bij,bjd->bid"}> : () -> ()
    %cst_24 = arith.constant dense<0.000000e+00> : vector<8x8x16xf32>
    %59 = tpu.matmul %58, %44, %cst_24 {dimension_numbers = #tpu.dot_dimension_numbers<[2], [1], [1], [2], [0, 0, 0, 1, 1, 2], [0], [0]>} : vector<8x8x8xbf16>, vector<8x8x16xbf16>, vector<8x8x16xf32> -> vector<8x8x16xf32>
    "tpu.trace_stop"() : () -> ()
    %c0_25 = arith.constant 0 : index
    %c0_26 = arith.constant 0 : index
    %c16 = arith.constant 16 : index
    %60 = vector.load %arg10[%c0_25, %c0_26, %c16] : memref<8x8x32xf32, #tpu.memory_space<vmem>>, vector<8x8x16xf32>
    tpu.vector_store %arg10[%c0_25, %c0_26, %c16], %59 {strides = array<i32>} : memref<8x8x32xf32, #tpu.memory_space<vmem>>, vector<8x8x16xf32>,
    %c0_27 = arith.constant 0 : index
    %c0_28 = arith.constant 0 : index
    %c0_29 = arith.constant 0 : index
    %61 = vector.load %arg10[%c0_27, %c0_28, %c0_29] : memref<8x8x32xf32, #tpu.memory_space<vmem>>, vector<8x8x32xf32>
    %62 = vector.shape_cast %61 : vector<8x8x32xf32> to vector<64x32xf32>
    %63 = arith.truncf %62 : vector<64x32xf32> to vector<64x32xbf16>
    %c0_30 = arith.constant 0 : index
    %c0_31 = arith.constant 0 : index
    %64 = vector.load %arg6[%c0_30, %c0_31] : memref<32x32xbf16, #tpu.memory_space<vmem>>, vector<32x32xbf16>
    %cst_32 = arith.constant dense<0.000000e+00> : vector<64x32xf32>
    %65 = tpu.matmul %63, %64, %cst_32 {dimension_numbers = #tpu.dot_dimension_numbers<[1], [0], [0], [1], [0, 0, 1, 1], [], []>} : vector<64x32xbf16>, vector<32x32xbf16>, vector<64x32xf32> -> vector<64x32xf32>
    %c0_33 = arith.constant 0 : index
    %c0_34 = arith.constant 0 : index
    %66 = vector.load %arg7[%c0_33, %c0_34] : memref<1x32xf32, #tpu.memory_space<vmem>>, vector<1x32xf32>
    %67 = vector.broadcast %66 : vector<1x32xf32> to vector<64x32xf32>
    %68 = arith.addf %65, %67 : vector<64x32xf32>
    %69 = math.tanh %68 : vector<64x32xf32>
    %70 = vector.shape_cast %69 : vector<64x32xf32> to vector<8x8x32xf32>
    %c0_35 = arith.constant 0 : index
    %c0_36 = arith.constant 0 : index
    %71 = vector.load %arg8[%c0_35, %c0_36] : memref<1x32xf32, #tpu.memory_space<vmem>>, vector<1x32xf32>
    %72 = vector.shape_cast %71 : vector<1x32xf32> to vector<1x1x32xf32>
    %73 = vector.broadcast %72 : vector<1x1x32xf32> to vector<8x8x32xf32>
    %74 = arith.mulf %70, %73 : vector<8x8x32xf32>
    %cst_37 = arith.constant dense<0.000000e+00> : vector<8x8xf32>
    %75 = vector.multi_reduction <add>, %74, %cst_37 [2] : vector<8x8x32xf32> to vector<8x8xf32>
    %cst_38 = arith.constant dense<0xFF800000> : vector<8xf32>
    %76 = vector.multi_reduction <maximumf>, %75, %cst_38 [1] : vector<8x8xf32> to vector<8xf32>
    %77 = vector.shape_cast %76 : vector<8xf32> to vector<8x1xf32>
    %78 = vector.broadcast %77 : vector<8x1xf32> to vector<8x8xf32>
    %79 = arith.subf %75, %78 : vector<8x8xf32>
    %80 = math.exp %79 : vector<8x8xf32>
    %cst_39 = arith.constant dense<0.000000e+00> : vector<8xf32>
    %81 = vector.multi_reduction <add>, %80, %cst_39 [1] : vector<8x8xf32> to vector<8xf32>
    %82 = vector.shape_cast %81 : vector<8xf32> to vector<8x1xf32>
    %83 = tpu.reciprocal %82 {approx = true} : vector<8x1xf32> -> vector<8x1xf32>
    %84 = vector.broadcast %83 : vector<8x1xf32> to vector<8x8xf32>
    %85 = arith.mulf %80, %84 : vector<8x8xf32>
    %86 = vector.shape_cast %85 : vector<8x8xf32> to vector<8x8x1xf32>
    %87 = vector.broadcast %86 : vector<8x8x1xf32> to vector<8x8x32xf32>
    %88 = arith.mulf %87, %61 : vector<8x8x32xf32>
    %cst_40 = arith.constant dense<0.000000e+00> : vector<8x32xf32>
    %89 = vector.multi_reduction <add>, %88, %cst_40 [1] : vector<8x8x32xf32> to vector<8x32xf32>
    %90 = vector.shape_cast %89 : vector<8x32xf32> to vector<8x1x32xf32>
    %91 = vector.broadcast %90 : vector<8x1x32xf32> to vector<8x8x32xf32>
    %92 = arith.mulf %16, %91 : vector<8x8x32xf32>
    %cst_41 = arith.constant dense<0.000000e+00> : vector<8x8xf32>
    %93 = vector.multi_reduction <add>, %92, %cst_41 [2] : vector<8x8x32xf32> to vector<8x8xf32>
    %94 = tpu.iota {dimensions = array<i32: 1>} : vector<1x8xi32>
    %c5_i32 = arith.constant 5 : i32
    %95 = vector.broadcast %c5_i32 : i32 to vector<1x8xi32>
    %96 = arith.cmpi slt, %94, %95 : vector<1x8xi32>
    %cst_42 = arith.constant -1.000000e+30 : f32
    %97 = vector.shape_cast %96 : vector<1x8xi1> to vector<1x8xi1>
    %98 = vector.broadcast %97 : vector<1x8xi1> to vector<8x8xi1>
    %99 = vector.broadcast %cst_42 : f32 to vector<8x8xf32>
    %100 = arith.select %98, %93, %99 : vector<8x8xi1>, vector<8x8xf32>
    %cst_43 = arith.constant dense<0xFF800000> : vector<8xf32>
    %101 = vector.multi_reduction <maximumf>, %100, %cst_43 [1] : vector<8x8xf32> to vector<8xf32>
    %102 = vector.shape_cast %101 : vector<8xf32> to vector<8x1xf32>
    %103 = vector.broadcast %102 : vector<8x1xf32> to vector<8x8xf32>
    %104 = arith.subf %100, %103 : vector<8x8xf32>
    %105 = math.exp %104 : vector<8x8xf32>
    %cst_44 = arith.constant dense<0.000000e+00> : vector<8xf32>
    %106 = vector.multi_reduction <add>, %105, %cst_44 [1] : vector<8x8xf32> to vector<8xf32>
    %107 = vector.shape_cast %106 : vector<8xf32> to vector<8x1xf32>
    %108 = vector.broadcast %107 : vector<8x1xf32> to vector<8x8xf32>
    %109 = arith.divf %105, %108 : vector<8x8xf32>
    %c0_45 = arith.constant 0 : index
    %c0_46 = arith.constant 0 : index
    %110 = vector.load %arg9[%c0_45, %c0_46] : memref<8x8xf32, #tpu.memory_space<vmem>>, vector<8x8xf32>
    tpu.vector_store %arg9[%c0_45, %c0_46], %109 {strides = array<i32>} : memref<8x8xf32, #tpu.memory_space<vmem>>, vector<8x8xf32>,
    return
  }
  func.func @transform_0(%arg0: i32) -> (i32, i32, i32) {
    %c0_i32 = arith.constant 0 : i32
    %c0_i32_0 = arith.constant 0 : i32
    %c0_i32_1 = arith.constant 0 : i32
    return %arg0, %c0_i32, %c0_i32_0 : i32, i32, i32
  }
  func.func @transform_1(%arg0: i32) -> (i32, i32) {
    %c0_i32 = arith.constant 0 : i32
    %c0_i32_0 = arith.constant 0 : i32
    %c0_i32_1 = arith.constant 0 : i32
    return %c0_i32, %c0_i32_0 : i32, i32
  }
  func.func @transform_2(%arg0: i32) -> (i32, i32) {
    %c0_i32 = arith.constant 0 : i32
    %c0_i32_0 = arith.constant 0 : i32
    %c0_i32_1 = arith.constant 0 : i32
    return %c0_i32, %c0_i32_0 : i32, i32
  }
  func.func @transform_3(%arg0: i32) -> (i32, i32) {
    %c0_i32 = arith.constant 0 : i32
    %c0_i32_0 = arith.constant 0 : i32
    %c0_i32_1 = arith.constant 0 : i32
    return %c0_i32, %c0_i32_0 : i32, i32
  }
  func.func @transform_4(%arg0: i32) -> (i32, i32) {
    %c0_i32 = arith.constant 0 : i32
    %c0_i32_0 = arith.constant 0 : i32
    %c0_i32_1 = arith.constant 0 : i32
    return %c0_i32, %c0_i32_0 : i32, i32
  }
  func.func @transform_5(%arg0: i32) -> (i32, i32) {
    %c0_i32 = arith.constant 0 : i32
    %c0_i32_0 = arith.constant 0 : i32
    %c0_i32_1 = arith.constant 0 : i32
    return %c0_i32, %c0_i32_0 : i32, i32
  }
  func.func @transform_6(%arg0: i32) -> (i32, i32) {
    %c0_i32 = arith.constant 0 : i32
    %c0_i32_0 = arith.constant 0 : i32
    %c0_i32_1 = arith.constant 0 : i32
    return %c0_i32, %c0_i32_0 : i32, i32
  }
  func.func @transform_7(%arg0: i32) -> (i32, i32) {
    %c0_i32 = arith.constant 0 : i32
    %c0_i32_0 = arith.constant 0 : i32
    %c0_i32_1 = arith.constant 0 : i32
    return %c0_i32, %c0_i32_0 : i32, i32
  }
  func.func @transform_8(%arg0: i32) -> (i32, i32) {
    %c0_i32 = arith.constant 0 : i32
    %c0_i32_0 = arith.constant 0 : i32
    return %arg0, %c0_i32 : i32, i32
  }
}

</mosaic_0001>

<bundles_post_ra>
// kernel: _lambda_.1
= control target key start
LH: loop header
LB: loop body
LE: loop exit
PB: predicated region body
PF: predicated region fallthrough
CT: control target
= control target key end

     0   :  { %s2411_s27 = smov 0   ;;  %s2937_s0 = inlined_call_operand.vmem [shape: bf16[16,16,32], index: 0, kind: input, shape index: {}]   ;;  %s2938_s1 = inlined_call_operand.vmem [shape: bf16[32,32], index: 1, kind: input, shape index: {}]   ;;  %s2939_s2 = inlined_call_operand.vmem [shape: f32[1,32], index: 2, kind: input, shape index: {}]   ;;  %s2940_s3 = inlined_call_operand.vmem [shape: bf16[32,128], index: 3, kind: input, shape index: {}]   ;;  %s2941_s4 = inlined_call_operand.vmem [shape: f32[1,128], index: 4, kind: input, shape index: {}]   ;;  %s2942_s5 = inlined_call_operand.vmem [shape: bf16[32,32], index: 5, kind: input, shape index: {}]   ;;  %s2943_s6 = inlined_call_operand.vmem [shape: f32[1,32], index: 6, kind: input, shape index: {}]   ;;  %s2944_s7 = inlined_call_operand.vmem [shape: f32[1,32], index: 7, kind: input, shape index: {}]   ;;  %s2945_s8 = inlined_call_operand.vmem [shape: f32[16,8], index: 8, kind: output, shape index: {}]  }
   0x1 LB: > { %s2417_s28 = sadd.s32 4294967295, %s2357_s27   ;;  %p2090_p0 = scmp.ge.s32.totalorder %s2357_s27, 1  ;;  %s2357_s27 = sphi %s2411_s27, %s18_s27  }
   0x2   : > { %p264_p1 = scmp.lt.s32.totalorder %s2357_s27, 3 }
   0x4   : > { %p265_p2 = pnand %p2090_p0, %p264_p1 }
   0x5   : > { %s2091_s9 = sshll.u32 (!%p265_p2), %s2417_s28, 3  ;;  %s2359_s24 = smov (!%p265_p2), 96  }
   0x6   : > { %268 = sbr.rel (%p265_p2) target bundleno = 2986 (0xbaa), region = 52  ;;  %p299_p3 = scmp.lt.s32.totalorder (!%p265_p2), %s2091_s9, 15 }
   0x7   : > { %s2360_s25 = smov (!%p265_p2), 64   ;;  %s2361_s26 = smov (!%p265_p2), 32  }
   0x8   : > { %s2362_s29 = smov (!%p265_p2), 48   ;;  %s2363_s30 = smov (!%p265_p2), 80  }
   0x9   : > { %p305_p4 = scmp.lt.s32.totalorder (!%p265_p2), %s2417_s28, 1 }
   0xb   : > { %v2215_v0 = vld [vmem:[%s2938_s1 + $0x8] sm:$0xff]  ;;  %v2214_v1 = vld [vmem:[%s2938_s1] sm:$0xff]  ;;  %s2947_s9 = smov (!%p299_p3, %s2091_s9), 15  ;;  %vm386_vm0 = vcmask 261120   ;;  %vm592_vm1 = vcmask 130048   ;;  %vm904_vm2 = vcmask 1043456  }
   0xc   : > { %417 = vmatpush.bf16.msra.mxu0 %v2215_v0  ;;  %2220 = vmatpush.bf16.msra.mxu1 %v2215_v0  ;;  %s2205_s12 = sshll.u32 %s2947_s9, 3  ;;  %v2217_v10 = vld [vmem:[%s2940_s3 + $0x8] sm:$0xff]  ;;  %v2216_v11 = vld [vmem:[%s2940_s3] sm:$0xff]  ;;  %vm802_vm3 = vcmask 64512   ;;  %s2364_s9 = smov 16   ;;  %vm1564_vm4 = vcmask 261248  }
   0xd   : > { %2221 = vmatpush.bf16.msra.mxu2 %v2215_v0  ;;  %2222 = vmatpush.bf16.msra.mxu3 %v2215_v0  ;;  %s303_s15 = scalar_lea.vmem %s2937_s0, %s2205_s12  ;;  %v2244_v13 = vld [vmem:[%s2939_s2] ss:$0 sm:$0xff]  ;;  %vm1708_vm5 = vcmask 1041409   ;;  %vm1710_vm6 = vcmask 1042434   ;;  %vm1712_vm7 = vcmask 1043459   ;;  %vm1714_vm8 = vcmask 1044484  }
   0xe   : > { %v2206_v2 = vld [vmem:[%s303_s15] sm:$0xff]  ;;  %v2207_v3 = vld [vmem:[%s303_s15 + $0x8] sm:$0xff]  ;;  %v2208_v4 = vld [vmem:[%s303_s15 + $0x10] sm:$0xff]  ;;  %vm1716_vm9 = vcmask 1045509   ;;  %vm1718_vm10 = vcmask 1046534   ;;  %vm1720_vm11 = vcmask 1047559  }
   0xf   : > { %v2211_v5 = vld [vmem:[%s303_s15 + $0x28] sm:$0xff]  ;;  %v2212_v6 = vld [vmem:[%s303_s15 + $0x30] sm:$0xff]  ;;  %v2213_v7 = vld [vmem:[%s303_s15 + $0x38] sm:$0xff]  ;;  %s2949_s28 = smov (!%p305_p4, %s2417_s28), 1 }
  0x10   : > { %418 = vmatpush.bf16.msra.mxu0 %v2214_v1  ;;  %2223 = vmatpush.bf16.msra.mxu1 %v2214_v1  ;;  %v2209_v8 = vld [vmem:[%s303_s15 + $0x18] sm:$0xff]  ;;  %v2210_v9 = vld [vmem:[%s303_s15 + $0x20] sm:$0xff]  ;;  %s2094_s20 = sshll.u32 %s2949_s28, 3 }
  0x11   : > { %2224 = vmatpush.bf16.msra.mxu2 %v2214_v1  ;;  %2225 = vmatpush.bf16.msra.mxu3 %v2214_v1  ;;  %s308_s23 = scalar_lea.vmem %s2945_s8, %s2094_s20 }
  0x13   : > { %2135 = vmatmul.msk.bf16.vlgmr.msra.gmra.mxu0 %vm386_vm0, %v2206_v2  ;;  %2140 = vmatmul.msk.bf16.vlgmr.msra.gmra.mxu1 %vm386_vm0, %v2211_v5  ;;  %v2245_v5 = vld [vmem:[%s2941_s4] ss:$0 sm:$0xff] }
  0x14   : > { %2141 = vmatmul.msk.bf16.vlgmr.msra.gmra.mxu2 %vm386_vm0, %v2212_v6  ;;  %2142 = vmatmul.msk.bf16.vlgmr.msra.gmra.mxu3 %vm386_vm0, %v2213_v7 }
  0x15   : > { %534 = vmatpush.bf16.msrb.mxu1 %v2217_v10 }
  0x19   : > { %535 = vmatpush.bf16.msrb.mxu1 %v2216_v11 }
  0x23   : > { %2136 = vmatmul.msk.bf16.gmra.mxu0 %vm386_vm0, %v2207_v3 }
  0x33   : > { %2137 = vmatmul.msk.bf16.gmra.mxu0 %vm386_vm0, %v2208_v4 }
  0x43   : > { %2138 = vmatmul.msk.bf16.gmra.mxu0 %vm386_vm0, %v2209_v8 }
  0x53   : > { %2139 = vmatmul.msk.bf16.gmra.mxu0 %vm386_vm0, %v2210_v9 }
  0x90   : > { %v420_v12 = vpop.f32.mrf.mxu0  ;;  %v445_v44 = vpop.f32.mrf.mxu1 }
  0x91   : > { %v421_v14 = vadd.f32 %v2244_v13, %v420_v12  ;;  %v446_v50 = vadd.f32 %v2244_v13, %v445_v44 }
  0x93   : > { %v460_v17 = vmax.f32 %v421_v14, 0.0  ;;  %v470_v53 = vmax.f32 %v446_v50, 0.0 }
  0x97   : > { %v450_v52 = vpop.f32.mrf.mxu2  ;;  %v455_v59 = vpop.f32.mrf.mxu3 }
  0x98   : > { %v422_v15 = vpop.f32.mrf.mxu0  ;;  %v447_v49 = vpop.f32.mrf.mxu1  ;;  %v451_v57 = vadd.f32 %v2244_v13, %v450_v52  ;;  %v456_v0 = vadd.f32 %v2244_v13, %v455_v59 }
  0x99   : > { %v423_v16 = vadd.f32 %v2244_v13, %v422_v15  ;;  %v448_v51 = vadd.f32 %v2244_v13, %v447_v49 }
  0x9a   : > { %v472_v60 = vmax.f32 %v451_v57, 0.0  ;;  %v474_v2 = vmax.f32 %v456_v0, 0.0 }
  0x9b   : > { %v461_v18 = vmax.f32 %v423_v16, 0.0  ;;  %v471_v54 = vmax.f32 %v448_v51, 0.0 }
  0x9d   : > { %v476_v19 = vpack.c.bf16 %v461_v18, %v460_v17  ;;  %v481_v55 = vpack.c.bf16 %v471_v54, %v470_v53 }
  0x9f   : > { %2151 = vmatmul.msk.bf16.vlgmr.msrb.gmra.mxu1 %vm386_vm0, %v476_v19  ;;  %v452_v56 = vpop.f32.mrf.mxu2  ;;  %v457_v63 = vpop.f32.mrf.mxu3 }
  0xa0   : > { %v425_v20 = vpop.f32.mrf.mxu0  ;;  %v453_v58 = vadd.f32 %v2244_v13, %v452_v56  ;;  %v458_v1 = vadd.f32 %v2244_v13, %v457_v63 }
  0xa1   : > { %v426_v21 = vadd.f32 %v2244_v13, %v425_v20 }
  0xa2   : > { %v473_v61 = vmax.f32 %v453_v58, 0.0  ;;  %v475_v3 = vmax.f32 %v458_v1, 0.0 }
  0xa3   : > { %v462_v24 = vmax.f32 %v426_v21, 0.0 }
  0xa4   : > { %v482_v62 = vpack.c.bf16 %v473_v61, %v472_v60  ;;  %v483_v4 = vpack.c.bf16 %v475_v3, %v474_v2 }
  0xa8   : > { %v427_v22 = vpop.f32.mrf.mxu0 }
  0xa9   : > { %v428_v23 = vadd.f32 %v2244_v13, %v427_v22 }
  0xab   : > { %v463_v25 = vmax.f32 %v428_v23, 0.0 }
  0xad   : > { %v477_v26 = vpack.c.bf16 %v463_v25, %v462_v24 }
  0xaf   : > { %2152 = vmatmul.msk.bf16.gmra.mxu1 %vm386_vm0, %v477_v26 }
  0xb0   : > { %v430_v27 = vpop.f32.mrf.mxu0 }
  0xb1   : > { %v431_v28 = vadd.f32 %v2244_v13, %v430_v27 }
  0xb3   : > { %v464_v31 = vmax.f32 %v431_v28, 0.0 }
  0xb8   : > { %v432_v29 = vpop.f32.mrf.mxu0 }
  0xb9   : > { %v433_v30 = vadd.f32 %v2244_v13, %v432_v29 }
  0xbb   : > { %v465_v32 = vmax.f32 %v433_v30, 0.0 }
  0xbd   : > { %v478_v33 = vpack.c.bf16 %v465_v32, %v464_v31 }
  0xbf   : > { %2153 = vmatmul.msk.bf16.gmra.mxu1 %vm386_vm0, %v478_v33 }
  0xc0   : > { %v435_v34 = vpop.f32.mrf.mxu0 }
  0xc1   : > { %v436_v35 = vadd.f32 %v2244_v13, %v435_v34 }
  0xc3   : > { %v466_v38 = vmax.f32 %v436_v35, 0.0 }
  0xc8   : > { %v437_v36 = vpop.f32.mrf.mxu0 }
  0xc9   : > { %v438_v37 = vadd.f32 %v2244_v13, %v437_v36 }
  0xcb   : > { %v467_v39 = vmax.f32 %v438_v37, 0.0 }
  0xcd   : > { %v479_v40 = vpack.c.bf16 %v467_v39, %v466_v38 }
  0xcf   : > { %2154 = vmatmul.msk.bf16.gmra.mxu1 %vm386_vm0, %v479_v40 }
  0xd0   : > { %v440_v41 = vpop.f32.mrf.mxu0 }
  0xd1   : > { %v441_v42 = vadd.f32 %v2244_v13, %v440_v41 }
  0xd3   : > { %v468_v46 = vmax.f32 %v441_v42, 0.0 }
  0xd8   : > { %v442_v43 = vpop.f32.mrf.mxu0 }
  0xd9   : > { %v443_v45 = vadd.f32 %v2244_v13, %v442_v43 }
  0xdb   : > { %v469_v47 = vmax.f32 %v443_v45, 0.0 }
  0xdd   : > { %v480_v48 = vpack.c.bf16 %v469_v47, %v468_v46 }
  0xdf   : > { %2155 = vmatmul.msk.bf16.gmra.mxu1 %vm386_vm0, %v480_v48 }
  0xef   : > { %2156 = vmatmul.msk.bf16.gmra.mxu1 %vm386_vm0, %v481_v55 }
  0xff   : > { %2157 = vmatmul.msk.bf16.gmra.mxu1 %vm386_vm0, %v482_v62 }
 0x10f   : > { %2158 = vmatmul.msk.bf16.gmra.mxu1 %vm386_vm0, %v483_v4 }
 0x11c   : > { %v537_v6 = vpop.f32.mrf.mxu1 }
 0x11d   : > { %v538_v7 = vadd.f32 %v2245_v5, %v537_v6 }
 0x11f   : > { %v577_v8 = vpack.c.bf16 %v538_v7, %v538_v7 }
 0x121   : > { %v586_v9 = vunpack.c.l.b16 %v577_v8 }
 0x123   : > { %v2459_v10 = vpack.c.b16 %v586_v9, %v586_v9 }
 0x124   : > { %v2461_v11 = vpop.f32.mrf.mxu1 }
 0x125   : > { %588 = vrot.lane.b32.xlu1 %v2459_v10, %s2359_s24  ;;  %590 = vrot.lane.b32.xlu0 %v2459_v10, %s2360_s25 }
 0x12c   : > { %v542_v12 = vpop.f32.mrf.mxu1 }
 0x12d   : > { %v543_v13 = vadd.f32 %v2245_v5, %v542_v12 }
 0x12f   : > { %v578_v14 = vpack.c.bf16 %v543_v13, %v543_v13 }
 0x131   : > { %v613_v15 = vunpack.c.l.b16 %v578_v14 }
 0x133   : > { %v2467_v16 = vpack.c.b16 %v613_v15, %v613_v15 }
 0x134   : > { %v2469_v17 = vpop.f32.mrf.mxu1 }
 0x135   : > { %615 = vrot.lane.b32.xlu1 %v2467_v16, %s2359_s24  ;;  %617 = vrot.lane.b32.xlu0 %v2467_v16, %s2360_s25 }
 0x13c   : > { %v547_v18 = vpop.f32.mrf.mxu1 }
 0x13d   : > { %v548_v19 = vadd.f32 %v2245_v5, %v547_v18 }
 0x13f   : > { %v579_v20 = vpack.c.bf16 %v548_v19, %v548_v19 }
 0x141   : > { %v639_v21 = vunpack.c.l.b16 %v579_v20 }
 0x143   : > { %v2475_v22 = vpack.c.b16 %v639_v21, %v639_v21 }
 0x144   : > { %v2477_v23 = vpop.f32.mrf.mxu1 }
 0x145   : > { %643 = vrot.lane.b32.xlu2 %v2475_v22, %s2360_s25  ;;  %641 = vrot.lane.b32.xlu0 %v2475_v22, %s2359_s24 }
 0x14c   : > { %v552_v24 = vpop.f32.mrf.mxu1 }
 0x14d   : > { %v553_v25 = vadd.f32 %v2245_v5, %v552_v24 }
 0x14f   : > { %v580_v26 = vpack.c.bf16 %v553_v25, %v553_v25 }
 0x151   : > { %v665_v27 = vunpack.c.l.b16 %v580_v26 }
 0x153   : > { %v2483_v28 = vpack.c.b16 %v665_v27, %v665_v27 }
 0x154   : > { %v2485_v29 = vpop.f32.mrf.mxu1 }
 0x155   : > { %669 = vrot.lane.b32.xlu2 %v2483_v28, %s2360_s25  ;;  %667 = vrot.lane.b32.xlu1 %v2483_v28, %s2359_s24 }
 0x15c   : > { %v557_v30 = vpop.f32.mrf.mxu1 }
 0x15d   : > { %v558_v31 = vadd.f32 %v2245_v5, %v557_v30 }
 0x15f   : > { %v581_v32 = vpack.c.bf16 %v558_v31, %v558_v31 }
 0x161   : > { %v691_v33 = vunpack.c.l.b16 %v581_v32 }
 0x163   : > { %v2491_v34 = vpack.c.b16 %v691_v33, %v691_v33 }
 0x164   : > { %v2493_v35 = vpop.f32.mrf.mxu1 }
 0x165   : > { %693 = vrot.lane.b32.xlu1 %v2491_v34, %s2359_s24  ;;  %695 = vrot.lane.b32.xlu2 %v2491_v34, %s2360_s25 }
 0x16c   : > { %v562_v36 = vpop.f32.mrf.mxu1 }
 0x16d   : > { %v563_v37 = vadd.f32 %v2245_v5, %v562_v36 }
 0x16f   : > { %v582_v38 = vpack.c.bf16 %v563_v37, %v563_v37 }
 0x171   : > { %v717_v39 = vunpack.c.l.b16 %v582_v38 }
 0x173   : > { %v2499_v40 = vpack.c.b16 %v717_v39, %v717_v39 }
 0x174   : > { %v2501_v41 = vpop.f32.mrf.mxu1 }
 0x175   : > { %721 = vrot.lane.b32.xlu0 %v2499_v40, %s2360_s25  ;;  %719 = vrot.lane.b32.xlu2 %v2499_v40, %s2359_s24 }
 0x17c   : > { %v567_v42 = vpop.f32.mrf.mxu1 }
 0x17d   : > { %v568_v43 = vadd.f32 %v2245_v5, %v567_v42 }
 0x17f   : > { %v583_v44 = vpack.c.bf16 %v568_v43, %v568_v43 }
 0x181   : > { %v743_v45 = vunpack.c.l.b16 %v583_v44 }
 0x183   : > { %v2507_v46 = vpack.c.b16 %v743_v45, %v743_v45 }
 0x184   : > { %v2509_v47 = vpop.f32.mrf.mxu1 }
 0x185   : > { %745 = vrot.lane.b32.xlu2 %v2507_v46, %s2359_s24  ;;  %747 = vrot.lane.b32.xlu0 %v2507_v46, %s2360_s25 }
 0x18c   : > { %v572_v48 = vpop.f32.mrf.mxu1 }
 0x18d   : > { %v573_v49 = vadd.f32 %v2245_v5, %v572_v48  ;;  %921 = vrot.lane.b32.xlu2 %v2467_v16, %s2361_s26 }
 0x18f   : > { %v584_v50 = vpack.c.bf16 %v573_v49, %v573_v49 }
 0x191   : > { %v769_v51 = vunpack.c.l.b16 %v584_v50 }
 0x193   : > { %v2516_v52 = vpack.c.b16 %v769_v51, %v769_v51 }
 0x195   : > { %773 = vrot.lane.b32.xlu1 %v2516_v52, %s2360_s25  ;;  %771 = vrot.lane.b32.xlu0 %v2516_v52, %s2359_s24 }
 0x196   : > { %1047 = vrot.lane.b32.xlu2 %v2516_v52, %s2361_s26 }
 0x197   : > { %v591_v53 = vpop.permute.xlu0 %590  ;;  %v589_v55 = vpop.permute.xlu1 %588 }
 0x198   : > { %v597_v54 = vsel %vm592_vm1, %v591_v53, 0 }
 0x199   : > { %606 = vmatpush.bf16.xpose.msrb.mxu2 %v597_v54 }
 0x19d   : > { %899 = vrot.lane.b32.xlu1 %v2459_v10, %s2361_s26  ;;  %942 = vrot.lane.b32.xlu0 %v2475_v22, %s2361_s26 }
 0x19f   : > { %v644_v56 = vpop.permute.xlu2 %643 }
 0x1a0   : > { %v649_v57 = vsel %vm592_vm1, %v644_v56, 0  ;;  %2159 = vmatmul.msk.bf16.vlgmr.msrb.gmra.mxu2 %vm592_vm1, %v589_v55 }
 0x1a1   : > { %658 = vmatpush.bf16.xpose.msra.mxu2 %v649_v57 }
 0x1a5   : > { %963 = vrot.lane.b32.xlu1 %v2483_v28, %s2361_s26  ;;  %984 = vrot.lane.b32.xlu0 %v2491_v34, %s2361_s26 }
 0x1a7   : > { %v618_v58 = vpop.permute.xlu0 %617  ;;  %v616_v60 = vpop.permute.xlu1 %615 }
 0x1a8   : > { %v623_v59 = vsel %vm592_vm1, %v618_v58, 0 }
 0x1a9   : > { %632 = vmatpush.bf16.xpose.msrb.mxu3 %v623_v59 }
 0x1ad   : > { %1026 = vrot.lane.b32.xlu1 %v2507_v46, %s2361_s26  ;;  %1005 = vrot.lane.b32.xlu0 %v2499_v40, %s2361_s26 }
 0x1af   : > { %v670_v61 = vpop.permute.xlu2 %669 }
 0x1b0   : > { %v675_v62 = vsel %vm592_vm1, %v670_v61, 0  ;;  %2160 = vmatmul.msk.bf16.vlgmr.msrb.gmra.mxu3 %vm592_vm1, %v616_v60 }
 0x1b1   : > { %684 = vmatpush.bf16.xpose.msra.mxu3 %v675_v62 }
 0x1b5   : > { %1078 = vrot.lane.b32.xlu1 %v2459_v10, %s2362_s29 }
 0x1b7   : > { %v642_v63 = vpop.permute.xlu0 %641 }
 0x1b8   : > { %2161 = vmatmul.msk.bf16.vlgmr.msra.gmra.mxu2 %vm592_vm1, %v642_v63 }
 0x1bf   : > { %v696_v0 = vpop.permute.xlu2 %695 }
 0x1c0   : > { %v701_v1 = vsel %vm592_vm1, %v696_v0, 0 }
 0x1c1   : > { %710 = vmatpush.bf16.xpose.msrb.mxu2 %v701_v1 }
 0x1c7   : > { %v668_v2 = vpop.permute.xlu1 %667 }
 0x1c8   : > { %2162 = vmatmul.msk.bf16.vlgmr.msra.gmra.mxu3 %vm592_vm1, %v668_v2 }
 0x1cf   : > { %v720_v6 = vpop.permute.xlu2 %719 }
 0x1d7   : > { %v694_v3 = vpop.permute.xlu1 %693 }
 0x1d8   : > { %2163 = vmatmul.msk.bf16.vlgmr.msrb.gmra.mxu2 %vm592_vm1, %v694_v3 }
 0x1df   : > { %v746_v9 = vpop.permute.xlu2 %745 }
 0x1e7   : > { %v722_v4 = vpop.permute.xlu0 %721  ;;  %v922_v12 = vpop.permute.xlu2 %921 }
 0x1e8   : > { %v727_v5 = vsel %vm592_vm1, %v722_v4, 0  ;;  %v927_v18 = vsel %vm904_vm2, %v922_v12, 0 }
 0x1e9   : > { %736 = vmatpush.bf16.xpose.msrb.mxu3 %v727_v5 }
 0x1f0   : > { %2164 = vmatmul.msk.bf16.vlgmr.msrb.gmra.mxu3 %vm592_vm1, %v720_v6 }
 0x1f7   : > { %v748_v7 = vpop.permute.xlu0 %747 }
 0x1f8   : > { %v753_v8 = vsel %vm592_vm1, %v748_v7, 0 }
 0x1f9   : > { %762 = vmatpush.bf16.xpose.msra.mxu2 %v753_v8 }
 0x200   : > { %2165 = vmatmul.msk.bf16.vlgmr.msra.gmra.mxu2 %vm592_vm1, %v746_v9 }
 0x207   : > { %v774_v13 = vpop.permute.xlu1 %773  ;;  %v772_v14 = vpop.permute.xlu0 %771 }
 0x208   : > { %v779_v15 = vsel %vm592_vm1, %v774_v13, 0  ;;  %v2564_v13 = vpop.permute.xlu2 %1047 }
 0x209   : > { %788 = vmatpush.bf16.xpose.msra.mxu3 %v779_v15 }
 0x20f   : > { %v900_v19 = vpop.permute.xlu1 %899  ;;  %v943_v20 = vpop.permute.xlu0 %942 }
 0x210   : > { %v906_v21 = vsel %vm904_vm2, %v900_v19, 0  ;;  %v948_v24 = vsel %vm904_vm2, %v943_v20, 0  ;;  %2166 = vmatmul.msk.bf16.vlgmr.msra.gmra.mxu3 %vm592_vm1, %v772_v14 }
 0x211   : > { %936 = vmatpush.bf16.msrb.mxu3 %v927_v18  ;;  %915 = vmatpush.bf16.msrb.mxu2 %v906_v21 }
 0x215   : > { %957 = vmatpush.bf16.msra.mxu2 %v948_v24 }
 0x217   : > { %v964_v25 = vpop.permute.xlu1 %963  ;;  %v2562_v12 = vpop.permute.xlu0 %984 }
 0x218   : > { %v969_v26 = vsel %vm904_vm2, %v964_v25, 0 }
 0x219   : > { %978 = vmatpush.bf16.msra.mxu3 %v969_v26 }
 0x21f   : > { %v2551_v27 = vpop.permute.xlu1 %1026  ;;  %v2570_v18 = vpop.permute.xlu0 %1005 }
 0x223   : > { %v608_v30 = vpop.f32.mrf.mxu2 }
 0x224   : > { %v794_v31 = vmul.f32 0.25, %v608_v30 }
 0x226   : > { %v803_v32 = vsel %vm802_vm3, %v794_v31, -inf }
 0x227   : > { %v1079_v33 = vpop.permute.xlu1 %1078  ;;  %804 = vmax.xlane.f32.xlu1 %v803_v32 }
 0x228   : > { %v1084_v36 = vsel %vm592_vm1, %v1079_v33, 0 }
 0x229   : > { %1093 = vmatpush.bf16.xpose.msrb.mxu0 %v1084_v36 }
 0x22b   : > { %v610_v37 = vpop.f32.mrf.mxu2 }
 0x233   : > { %v634_v38 = vpop.f32.mrf.mxu3 }
 0x234   : > { %v795_v39 = vmul.f32 0.25, %v634_v38 }
 0x236   : > { %v806_v42 = vsel %vm802_vm3, %v795_v39, -inf }
 0x237   : > { %807 = vmax.xlane.f32.xlu2 %v806_v42 }
 0x23b   : > { %v636_v43 = vpop.f32.mrf.mxu3  ;;  %v660_v44 = vpop.f32.mrf.mxu2 }
 0x23c   : > { %v796_v45 = vmul.f32 0.25, %v660_v44 }
 0x23e   : > { %v809_v48 = vsel %vm802_vm3, %v796_v45, -inf }
 0x23f   : > { %810 = vmax.xlane.f32.xlu0 %v809_v48 }
 0x243   : > { %v662_v49 = vpop.f32.mrf.mxu2 }
 0x24b   : > { %v686_v50 = vpop.f32.mrf.mxu3 }
 0x24c   : > { %v797_v51 = vmul.f32 0.25, %v686_v50 }
 0x24e   : > { %v812_v53 = vsel %vm802_vm3, %v797_v51, -inf }
 0x24f   : > { %813 = vmax.xlane.f32.xlu2 %v812_v53 }
 0x253   : > { %v688_v54 = vpop.f32.mrf.mxu3 }
 0x25b   : > { %v712_v55 = vpop.f32.mrf.mxu2 }
 0x25c   : > { %v798_v56 = vmul.f32 0.25, %v712_v55 }
 0x25e   : > { %v815_v57 = vsel %vm802_vm3, %v798_v56, -inf }
 0x25f   : > { %816 = vmax.xlane.f32.xlu1 %v815_v57 }
 0x263   : > { %v714_v58 = vpop.f32.mrf.mxu2 }
 0x273   : > { %v738_v59 = vpop.f32.mrf.mxu3 }
 0x274   : > { %v799_v60 = vmul.f32 0.25, %v738_v59 }
 0x276   : > { %v818_v61 = vsel %vm802_vm3, %v799_v60, -inf }
 0x277   : > { %819 = vmax.xlane.f32.xlu2 %v818_v61 }
 0x27b   : > { %v740_v62 = vpop.f32.mrf.mxu3 }
 0x283   : > { %v764_v63 = vpop.f32.mrf.mxu2 }
 0x284   : > { %v800_v0 = vmul.f32 0.25, %v764_v63 }
 0x286   : > { %v821_v1 = vsel %vm802_vm3, %v800_v0, -inf }
 0x287   : > { %822 = vmax.xlane.f32.xlu0 %v821_v1 }
 0x28b   : > { %v766_v2 = vpop.f32.mrf.mxu2 }
 0x293   : > { %v790_v3 = vpop.f32.mrf.mxu3 }
 0x294   : > { %v801_v4 = vmul.f32 0.25, %v790_v3 }
 0x296   : > { %v824_v5 = vsel %vm802_vm3, %v801_v4, -inf }
 0x297   : > { %825 = vmax.xlane.f32.xlu1 %v824_v5 }
 0x29a   : > { %v805_v6 = vpop.xlane.xlu1 %804 }
 0x29b   : > { %v827_v7 = vsub.f32 %v794_v31, %v805_v6  ;;  %v792_v8 = vpop.f32.mrf.mxu3 }
 0x29d   : > { %v835_v9 = vmul.f32 1.442695, %v827_v7  ;;  %v990_v7 = vsel %vm904_vm2, %v2562_v12, 0 }
 0x29f   : > { %2248 = vpow2.f32 %v835_v9 }
 0x2a5   : > { %v2566_v14 = vpop.eup %2248 }
 0x2a6   : > { %v851_v15 = vsel %vm802_vm3, %v2566_v14, 0.0 }
 0x2a7   : > { %852 = vadd.xlane.f32.xlu2 %v851_v15 }
 0x2aa   : > { %v808_v19 = vpop.xlane.xlu2 %807 }
 0x2ab   : > { %v828_v20 = vsub.f32 %v795_v39, %v808_v19 }
 0x2ad   : > { %v837_v21 = vmul.f32 1.442695, %v828_v20  ;;  %v1011_v20 = vsel %vm904_vm2, %v2570_v18, 0 }
 0x2af   : > { %2250 = vpow2.f32 %v837_v21 }
 0x2b0   : > { %1147 = vrot.lane.b32.xlu1 %v2483_v28, %s2362_s29 }
 0x2b2   : > { %v811_v24 = vpop.xlane.xlu0 %810 }
 0x2b3   : > { %v829_v25 = vsub.f32 %v796_v45, %v811_v24 }
 0x2b5   : > { %v2574_v26 = vpop.eup %2250  ;;  %v839_v30 = vmul.f32 1.442695, %v829_v25 }
 0x2b6   : > { %v854_v31 = vsel %vm802_vm3, %v2574_v26, 0.0 }
 0x2b7   : > { %2252 = vpow2.f32 %v839_v30  ;;  %855 = vadd.xlane.f32.xlu0 %v854_v31  ;;  %v1032_v30 = vsel %vm904_vm2, %v2551_v27, 0 }
 0x2bd   : > { %v2578_v32 = vpop.eup %2252 }
 0x2be   : > { %v857_v33 = vsel %vm802_vm3, %v2578_v32, 0.0 }
 0x2bf   : > { %1124 = vrot.lane.b32.xlu2 %v2475_v22, %s2362_s29  ;;  %858 = vadd.xlane.f32.xlu0 %v857_v33 }
 0x2c2   : > { %v814_v36 = vpop.xlane.xlu2 %813 }
 0x2c3   : > { %v830_v37 = vsub.f32 %v797_v51, %v814_v36 }
 0x2c5   : > { %v841_v38 = vmul.f32 1.442695, %v830_v37 }
 0x2c7   : > { %2254 = vpow2.f32 %v841_v38  ;;  %1076 = vrot.lane.b32.xlu2 %v2459_v10, %s2363_s30 }
 0x2cd   : > { %v2586_v39 = vpop.eup %2254 }
 0x2ce   : > { %v860_v42 = vsel %vm802_vm3, %v2586_v39, 0.0 }
 0x2cf   : > { %861 = vadd.xlane.f32.xlu0 %v860_v42 }
 0x2d2   : > { %v817_v43 = vpop.xlane.xlu1 %816 }
 0x2d3   : > { %v831_v44 = vsub.f32 %v798_v56, %v817_v43 }
 0x2d5   : > { %v843_v45 = vmul.f32 1.442695, %v831_v44 }
 0x2d7   : > { %2256 = vpow2.f32 %v843_v45 }
 0x2dd   : > { %v2592_v50 = vpop.eup %2256 }
 0x2de   : > { %v863_v53 = vsel %vm802_vm3, %v2592_v50, 0.0 }
 0x2e3   : > { %1101 = vrot.lane.b32.xlu0 %v2467_v16, %s2362_s29 }
 0x2ea   : > { %v820_v48 = vpop.xlane.xlu2 %819 }
 0x2eb   : > { %v832_v49 = vsub.f32 %v799_v60, %v820_v48 }
 0x2ed   : > { %v845_v51 = vmul.f32 1.442695, %v832_v49 }
 0x2ef   : > { %2258 = vpow2.f32 %v845_v51 }
 0x2f0   : > { %864 = vadd.xlane.f32.xlu2 %v863_v53 }
 0x2f5   : > { %v2596_v54 = vpop.eup %2258 }
 0x2f6   : > { %v866_v55 = vsel %vm802_vm3, %v2596_v54, 0.0 }
 0x2f7   : > { %867 = vadd.xlane.f32.xlu1 %v866_v55 }
 0x2fa   : > { %v823_v56 = vpop.xlane.xlu0 %822 }
 0x2fb   : > { %v833_v57 = vsub.f32 %v800_v0, %v823_v56 }
 0x2fd   : > { %v847_v58 = vmul.f32 1.442695, %v833_v57 }
 0x2ff   : > { %2260 = vpow2.f32 %v847_v58 }
 0x305   : > { %v2600_v59 = vpop.eup %2260 }
 0x306   : > { %v869_v62 = vsel %vm802_vm3, %v2600_v59, 0.0 }
 0x30a   : > { %v826_v60 = vpop.xlane.xlu1 %825 }
 0x30b   : > { %v834_v61 = vsub.f32 %v801_v4, %v826_v60 }
 0x30d   : > { %v849_v63 = vmul.f32 1.442695, %v834_v61  ;;  %870 = vadd.xlane.f32.xlu0 %v869_v62 }
 0x30f   : > { %2262 = vpow2.f32 %v849_v63 }
 0x310   : > { %1099 = vrot.lane.b32.xlu1 %v2467_v16, %s2363_s30 }
 0x315   : > { %v2606_v1 = vpop.eup %2262 }
 0x316   : > { %v872_v0 = vsel %vm802_vm3, %v2606_v1, 0.0 }
 0x317   : > { %873 = vadd.xlane.f32.xlu2 %v872_v0 }
 0x318   : > { %1170 = vrot.lane.b32.xlu1 %v2491_v34, %s2362_s29 }
 0x31a   : > { %v853_v2 = vpop.xlane.xlu2 %852 }
 0x31b   : > { %2264 = vrcp.f32 %v853_v2 }
 0x320   : > { %1239 = vrot.lane.b32.xlu1 %v2516_v52, %s2362_s29 }
 0x321   : > { %v2265_v3 = vpop.eup %2264  ;;  %1145 = vrot.lane.b32.xlu0 %v2483_v28, %s2363_s30 }
 0x322   : > { %v883_v4 = vmul.f32 %v2265_v3, %v2566_v14  ;;  %v1125_v5 = vpop.permute.xlu2 %1124  ;;  %v1148_v37 = vpop.permute.xlu1 %1147 }
 0x323   : > { %v1130_v45 = vsel %vm592_vm1, %v1125_v5, 0  ;;  %v1153_v51 = vsel %vm592_vm1, %v1148_v37, 0 }
 0x324   : > { %v891_v6 = vpack.c.bf16 %v883_v4, %v883_v4 }
 0x326   : > { %2167 = vmatmul.msk.bf16.vlgmr.msrb.gmra.mxu2 %vm802_vm3, %v891_v6 }
 0x327   : > { %999 = vmatpush.bf16.msrb.mxu2 %v990_v7 }
 0x328   : > { %1214 = vrot.lane.b32.xlu1 %v2507_v46, %s2363_s30 }
 0x329   : > { %1216 = vrot.lane.b32.xlu0 %v2507_v46, %s2362_s29 }
 0x32a   : > { %v1077_v8 = vpop.permute.xlu2 %1076  ;;  %v856_v9 = vpop.xlane.xlu0 %855 }
 0x32b   : > { %2266 = vrcp.f32 %v856_v9  ;;  %2175 = vmatmul.msk.bf16.vlgmr.msrb.gmra.mxu0 %vm592_vm1, %v1077_v8 }
 0x32f   : > { %1122 = vrot.lane.b32.xlu2 %v2475_v22, %s2363_s30 }
 0x331   : > { %v2267_v14 = vpop.eup %2266  ;;  %1191 = vrot.lane.b32.xlu0 %v2499_v40, %s2363_s30 }
 0x332   : > { %v884_v12 = vmul.f32 %v2267_v14, %v2574_v26  ;;  %v859_v15 = vpop.xlane.xlu0 %858 }
 0x333   : > { %2268 = vrcp.f32 %v859_v15 }
 0x334   : > { %v892_v19 = vpack.c.bf16 %v884_v12, %v884_v12 }
 0x336   : > { %2168 = vmatmul.msk.bf16.vlgmr.msrb.gmra.mxu3 %vm802_vm3, %v892_v19 }
 0x337   : > { %1020 = vmatpush.bf16.msrb.mxu3 %v1011_v20  ;;  %1193 = vrot.lane.b32.xlu2 %v2499_v40, %s2362_s29 }
 0x339   : > { %v2269_v21 = vpop.eup %2268 }
 0x33a   : > { %v885_v24 = vmul.f32 %v2269_v21, %v2578_v32  ;;  %v1053_v32 = vsel %vm904_vm2, %v2564_v13, 0 }
 0x33c   : > { %v893_v25 = vpack.c.bf16 %v885_v24, %v885_v24 }
 0x33e   : > { %2169 = vmatmul.msk.bf16.vlgmr.msra.gmra.mxu2 %vm802_vm3, %v893_v25 }
 0x33f   : > { %1041 = vmatpush.bf16.msra.mxu2 %v1032_v30  ;;  %1168 = vrot.lane.b32.xlu2 %v2491_v34, %s2363_s30 }
 0x342   : > { %v862_v18 = vpop.xlane.xlu0 %861 }
 0x343   : > { %2270 = vrcp.f32 %v862_v18 }
 0x347   : > { %1237 = vrot.lane.b32.xlu2 %v2516_v52, %s2363_s30 }
 0x349   : > { %v2271_v26 = vpop.eup %2270 }
 0x34a   : > { %v886_v31 = vmul.f32 %v2271_v26, %v2586_v39 }
 0x34c   : > { %v894_v33 = vpack.c.bf16 %v886_v31, %v886_v31 }
 0x34e   : > { %2170 = vmatmul.msk.bf16.vlgmr.msra.gmra.mxu3 %vm802_vm3, %v894_v33 }
 0x34f   : > { %1062 = vmatpush.bf16.msra.mxu3 %v1053_v32 }
 0x355   : > { %v1102_v27 = vpop.permute.xlu0 %1101 }
 0x356   : > { %v1107_v36 = vsel %vm592_vm1, %v1102_v27, 0  ;;  %v2675_v27 = vpop.f32.mrf.mxu1 }
 0x357   : > { %1116 = vmatpush.bf16.xpose.msra.mxu1 %v1107_v36 }
 0x363   : > { %v865_v38 = vpop.xlane.xlu2 %864 }
 0x364   : > { %2272 = vrcp.f32 %v865_v38 }
 0x36a   : > { %v2273_v42 = vpop.eup %2272  ;;  %v868_v43 = vpop.xlane.xlu1 %867 }
 0x36b   : > { %v887_v44 = vmul.f32 %v2273_v42, %v2592_v50  ;;  %2274 = vrcp.f32 %v868_v43 }
 0x36d   : > { %v895_v39 = vpack.c.bf16 %v887_v44, %v887_v44 }
 0x36f   : > { %2171 = vmatmul.msk.bf16.vlgmr.msrb.gmra.mxu2 %vm802_vm3, %v895_v39 }
 0x370   : > { %1139 = vmatpush.bf16.xpose.msrb.mxu2 %v1130_v45 }
 0x371   : > { %v2275_v13 = vpop.eup %2274 }
 0x372   : > { %v888_v48 = vmul.f32 %v2275_v13, %v2596_v54 }
 0x374   : > { %v896_v49 = vpack.c.bf16 %v888_v48, %v888_v48 }
 0x376   : > { %2172 = vmatmul.msk.bf16.vlgmr.msrb.gmra.mxu3 %vm802_vm3, %v896_v49 }
 0x377   : > { %1162 = vmatpush.bf16.xpose.msrb.mxu3 %v1153_v51 }
 0x380   : > { %v871_v53 = vpop.xlane.xlu0 %870 }
 0x381   : > { %2276 = vrcp.f32 %v871_v53 }
 0x382   : > { %v1100_v55 = vpop.permute.xlu1 %1099 }
 0x383   : > { %2176 = vmatmul.msk.bf16.vlgmr.msra.gmra.mxu1 %vm592_vm1, %v1100_v55 }
 0x387   : > { %v2277_v50 = vpop.eup %2276 }
 0x388   : > { %v889_v56 = vmul.f32 %v2277_v50, %v2600_v59 }
 0x38a   : > { %v897_v57 = vpack.c.bf16 %v889_v56, %v889_v56  ;;  %v874_v58 = vpop.xlane.xlu2 %873  ;;  %v1171_v60 = vpop.permute.xlu1 %1170 }
 0x38b   : > { %2278 = vrcp.f32 %v874_v58  ;;  %v1176_v54 = vsel %vm592_vm1, %v1171_v60, 0 }
 0x38c   : > { %2173 = vmatmul.msk.bf16.vlgmr.msra.gmra.mxu2 %vm802_vm3, %v897_v57  ;;  %1185 = vmatpush.bf16.xpose.msra.mxu0 %v1176_v54 }
 0x391   : > { %v2279_v61 = vpop.eup %2278 }
 0x392   : > { %v890_v62 = vmul.f32 %v2279_v61, %v2606_v1  ;;  %v1123_v63 = vpop.permute.xlu2 %1122  ;;  %v1240_v0 = vpop.permute.xlu1 %1239 }
 0x393   : > { %v1146_v2 = vpop.permute.xlu0 %1145  ;;  %v1245_v4 = vsel %vm592_vm1, %v1240_v0, 0 }
 0x394   : > { %v898_v3 = vpack.c.bf16 %v890_v62, %v890_v62 }
 0x396   : > { %2174 = vmatmul.msk.bf16.vlgmr.msra.gmra.mxu3 %vm802_vm3, %v898_v3 }
 0x397   : > { %1254 = vmatpush.bf16.xpose.msra.mxu3 %v1245_v4 }
 0x39a   : > { %v1194_v59 = vpop.permute.xlu2 %1193  ;;  %v1215_v15 = vpop.permute.xlu1 %1214 }
 0x39b   : > { %v1199_v5 = vsel %vm592_vm1, %v1194_v59, 0  ;;  %v1217_v6 = vpop.permute.xlu0 %1216 }
 0x39c   : > { %v1222_v7 = vsel %vm592_vm1, %v1217_v6, 0  ;;  %2177 = vmatmul.msk.bf16.vlgmr.msrb.gmra.mxu2 %vm592_vm1, %v1123_v63  ;;  %1208 = vmatpush.bf16.xpose.msrb.mxu1 %v1199_v5 }
 0x39d   : > { %1231 = vmatpush.bf16.xpose.msra.mxu2 %v1222_v7 }
 0x3a2   : > { %v1169_v1 = vpop.permute.xlu2 %1168 }
 0x3a3   : > { %2179 = vmatmul.msk.bf16.vlgmr.msra.gmra.mxu0 %vm592_vm1, %v1169_v1  ;;  %v1192_v8 = vpop.permute.xlu0 %1191 }
 0x3a4   : > { %2180 = vmatmul.msk.bf16.vlgmr.msrb.gmra.mxu1 %vm592_vm1, %v1192_v8 }
 0x3a6   : > { %2178 = vmatmul.msk.bf16.vlgmr.msrb.gmra.mxu3 %vm592_vm1, %v1146_v2 }
 0x3a8   : > { %v1095_v9 = vpop.f32.mrf.mxu0 }
 0x3a9   : > { %v1260_v14 = vmul.f32 0.25, %v1095_v9  ;;  %v917_v12 = vpop.f32.mrf.mxu2 }
 0x3aa   : > { %1068 = vst.msk [vmem:[#allocation2] sm:$0xff] %vm592_vm1, %v917_v12  ;;  %v1238_v24 = vpop.permute.xlu2 %1237 }
 0x3ab   : > { %v1268_v19 = vsel %vm802_vm3, %v1260_v14, -inf }
 0x3ac   : > { %1269 = vmax.xlane.f32.xlu0 %v1268_v19  ;;  %2181 = vmatmul.msk.bf16.vlgmr.msra.gmra.mxu2 %vm592_vm1, %v1215_v15 }
 0x3b0   : > { %v1097_v20 = vpop.f32.mrf.mxu0 }
 0x3b1   : > { %v919_v21 = vpop.f32.mrf.mxu2 }
 0x3b6   : > { %2182 = vmatmul.msk.bf16.vlgmr.msra.gmra.mxu3 %vm592_vm1, %v1238_v24 }
 0x3b9   : > { %v938_v25 = vpop.f32.mrf.mxu3 }
 0x3ba   : > { %1069 = vst.msk [vmem:[#allocation2 + $0x8] sm:$0xff] %vm592_vm1, %v938_v25 }
 0x3c1   : > { %v940_v30 = vpop.f32.mrf.mxu3  ;;  %v959_v18 = vpop.f32.mrf.mxu2 }
 0x3c2   : > { %1070 = vst.msk [vmem:[#allocation2 + $0x10] sm:$0xff] %vm592_vm1, %v959_v18 }
 0x3c9   : > { %v961_v26 = vpop.f32.mrf.mxu2 }
 0x3d1   : > { %v980_v31 = vpop.f32.mrf.mxu3 }
 0x3d2   : > { %1071 = vst.msk [vmem:[#allocation2 + $0x18] sm:$0xff] %vm592_vm1, %v980_v31 }
 0x3d9   : > { %v982_v33 = vpop.f32.mrf.mxu3 }
 0x3f2   : > { %v1001_v32 = vpop.f32.mrf.mxu2 }
 0x3f3   : > { %1072 = vst.msk [vmem:[#allocation2 + $0x20] sm:$0xff] %vm592_vm1, %v1001_v32 }
 0x3f9   : > { %v1022_v36 = vpop.f32.mrf.mxu3 }
 0x3fa   : > { %1073 = vst.msk [vmem:[#allocation2 + $0x28] sm:$0xff] %vm592_vm1, %v1022_v36  ;;  %v1003_v37 = vpop.f32.mrf.mxu2 }
 0x400   : > { %v1118_v38 = vpop.f32.mrf.mxu1 }
 0x401   : > { %v1261_v42 = vmul.f32 0.25, %v1118_v38  ;;  %v1024_v43 = vpop.f32.mrf.mxu3 }
 0x403   : > { %v1271_v44 = vsel %vm802_vm3, %v1261_v42, -inf }
 0x404   : > { %1272 = vmax.xlane.f32.xlu1 %v1271_v44 }
 0x408   : > { %v1120_v39 = vpop.f32.mrf.mxu1 }
 0x40f   : > { %v1043_v45 = vpop.f32.mrf.mxu2 }
 0x410   : > { %1074 = vst.msk [vmem:[#allocation2 + $0x30] sm:$0xff] %vm592_vm1, %v1043_v45 }
 0x417   : > { %v1045_v13 = vpop.f32.mrf.mxu2 }
 0x419   : > { %v1064_v48 = vpop.f32.mrf.mxu3 }
 0x41a   : > { %1075 = vst.msk [vmem:[#allocation2 + $0x38] sm:$0xff] %vm592_vm1, %v1064_v48 }
 0x41f   : > { %v1141_v49 = vpop.f32.mrf.mxu2  ;;  %v1270_v51 = vpop.xlane.xlu0 %1269 }
 0x420   : > { %v1292_v53 = vsub.f32 %v1260_v14, %v1270_v51  ;;  %v1187_v55 = vpop.f32.mrf.mxu0  ;;  %v2684_v5 = vmul.f32 0.25, %v1141_v49 }
 0x421   : > { %v1264_v50 = vmul.f32 0.25, %v1187_v55  ;;  %v1066_v56 = vpop.f32.mrf.mxu3  ;;  %v1210_v57 = vpop.f32.mrf.mxu1 }
 0x422   : > { %v1300_v58 = vmul.f32 1.442695, %v1292_v53  ;;  %v1265_v60 = vmul.f32 0.25, %v1210_v57  ;;  %v1274_v7 = vsel %vm802_vm3, %v2684_v5, -inf }
 0x423   : > { %v1280_v54 = vsel %vm802_vm3, %v1264_v50, -inf }
 0x424   : > { %2280 = vpow2.f32 %v1300_v58  ;;  %1281 = vmax.xlane.f32.xlu1 %v1280_v54  ;;  %v1283_v61 = vsel %vm802_vm3, %v1265_v60, -inf }
 0x425   : > { %1284 = vmax.xlane.f32.xlu2 %v1283_v61 }
 0x427   : > { %v1143_v62 = vpop.f32.mrf.mxu2 }
 0x428   : > { %v1189_v63 = vpop.f32.mrf.mxu0 }
 0x429   : > { %v1164_v0 = vpop.f32.mrf.mxu3  ;;  %v1212_v2 = vpop.f32.mrf.mxu1 }
 0x42a   : > { %v2281_v3 = vpop.eup %2280  ;;  %v1263_v13 = vmul.f32 0.25, %v1164_v0 }
 0x42b   : > { %v1316_v4 = vsel %vm802_vm3, %v2281_v3, 0.0 }
 0x42c   : > { %v1277_v48 = vsel %vm802_vm3, %v1263_v13, -inf }
 0x42d   : > { %1317 = vadd.xlane.f32.xlu2 %v1316_v4 }
 0x42f   : > { %v1233_v59 = vpop.f32.mrf.mxu2 }
 0x430   : > { %v1266_v49 = vmul.f32 0.25, %v1233_v59 }
 0x431   : > { %v1166_v6 = vpop.f32.mrf.mxu3 }
 0x432   : > { %v1286_v51 = vsel %vm802_vm3, %v1266_v49, -inf }
 0x435   : > { %1275 = vmax.xlane.f32.xlu2 %v1274_v7 }
 0x437   : > { %v1235_v1 = vpop.f32.mrf.mxu2 }
 0x439   : > { %v1256_v8 = vpop.f32.mrf.mxu3 }
 0x43a   : > { %v1267_v14 = vmul.f32 0.25, %v1256_v8 }
 0x43c   : > { %v1289_v12 = vsel %vm802_vm3, %v1267_v14, -inf }
 0x43d   : > { %1364 = vrot.lane.b32.xlu1 %v2459_v10, %s2364_s9 }
 0x441   : > { %v1258_v9 = vpop.f32.mrf.mxu3 }
 0x44d   : > { %1385 = vrot.lane.b32.xlu2 %v2467_v16, %s2364_s9 }
 0x467   : > { %1290 = vmax.xlane.f32.xlu1 %v1289_v12 }
 0x477   : > { %v1273_v15 = vpop.xlane.xlu1 %1272 }
 0x478   : > { %v1293_v19 = vsub.f32 %v1261_v42, %v1273_v15 }
 0x47a   : > { %v1302_v20 = vmul.f32 1.442695, %v1293_v19 }
 0x47c   : > { %2282 = vpow2.f32 %v1302_v20 }
 0x480   : > { %1427 = vrot.lane.b32.xlu1 %v2483_v28, %s2364_s9 }
 0x482   : > { %v2283_v21 = vpop.eup %2282 }
 0x483   : > { %v1319_v24 = vsel %vm802_vm3, %v2283_v21, 0.0 }
 0x484   : > { %1320 = vadd.xlane.f32.xlu0 %v1319_v24 }
 0x497   : > { %v1282_v10 = vpop.xlane.xlu1 %1281 }
 0x498   : > { %v1296_v25 = vsub.f32 %v1264_v50, %v1282_v10  ;;  %1406 = vrot.lane.b32.xlu0 %v2475_v22, %s2364_s9  ;;  %v1285_v16 = vpop.xlane.xlu2 %1284 }
 0x499   : > { %v1297_v30 = vsub.f32 %v1265_v60, %v1285_v16 }
 0x49a   : > { %v1308_v18 = vmul.f32 1.442695, %v1296_v25 }
 0x49b   : > { %v1310_v26 = vmul.f32 1.442695, %v1297_v30 }
 0x49c   : > { %2284 = vpow2.f32 %v1308_v18 }
 0x49d   : > { %2286 = vpow2.f32 %v1310_v26 }
 0x4a0   : > { %v1318_v31 = vpop.xlane.xlu2 %1317 }
 0x4a1   : > { %2288 = vrcp.f32 %v1318_v31 }
 0x4a2   : > { %v2698_v33 = vpop.eup %2284 }
 0x4a3   : > { %v1328_v28 = vsel %vm802_vm3, %v2698_v33, 0.0  ;;  %v2702_v32 = vpop.eup %2286 }
 0x4a4   : > { %1329 = vadd.xlane.f32.xlu2 %v1328_v28  ;;  %v1331_v22 = vsel %vm802_vm3, %v2702_v32, 0.0 }
 0x4a7   : > { %v2289_v37 = vpop.eup %2288 }
 0x4a8   : > { %v1276_v36 = vpop.xlane.xlu2 %1275  ;;  %v1348_v38 = vmul.f32 %v2289_v37, %v2281_v3 }
 0x4a9   : > { %v1294_v60 = vsub.f32 %v2684_v5, %v1276_v36 }
 0x4aa   : > { %1332 = vadd.xlane.f32.xlu1 %v1331_v22  ;;  %v1356_v45 = vpack.c.bf16 %v1348_v38, %v1348_v38 }
 0x4ab   : > { %v1304_v61 = vmul.f32 1.442695, %v1294_v60  ;;  %v2219_v60 = vld [vmem:[%s2942_s5 + $0x8] sm:$0xff] }
 0x4af   : > { %v1365_v42 = vpop.permute.xlu1 %1364 }
 0x4b0   : > { %v1370_v43 = vsel %vm904_vm2, %v1365_v42, 0  ;;  %v1386_v44 = vpop.permute.xlu2 %1385 }
 0x4b1   : > { %v1391_v39 = vsel %vm904_vm2, %v1386_v44, 0  ;;  %1379 = vmatpush.bf16.msrb.mxu0 %v1370_v43 }
 0x4b2   : > { %1400 = vmatpush.bf16.msra.mxu1 %v1391_v39 }
 0x4b4   : > { %2183 = vmatmul.msk.bf16.vlgmr.msrb.gmra.mxu0 %vm802_vm3, %v1356_v45 }
 0x4c2   : > { %1278 = vmax.xlane.f32.xlu0 %v1277_v48 }
 0x4c3   : > { %1490 = vrot.lane.b32.xlu1 %v2507_v46, %s2364_s9 }
 0x4ca   : > { %1287 = vmax.xlane.f32.xlu0 %v1286_v51 }
 0x4da   : > { %v1291_v53 = vpop.xlane.xlu1 %1290 }
 0x4db   : > { %v1299_v55 = vsub.f32 %v1267_v14, %v1291_v53 }
 0x4dd   : > { %v1314_v50 = vmul.f32 1.442695, %v1299_v55 }
 0x4de   : > { %1448 = vrot.lane.b32.xlu0 %v2491_v34, %s2364_s9 }
 0x4df   : > { %2290 = vpow2.f32 %v1314_v50 }
 0x4e5   : > { %v2715_v56 = vpop.eup %2290 }
 0x4e6   : > { %v1337_v57 = vsel %vm802_vm3, %v2715_v56, 0.0 }
 0x4e7   : > { %1338 = vadd.xlane.f32.xlu2 %v1337_v57 }
 0x4f2   : > { %v1428_v58 = vpop.permute.xlu1 %1427 }
 0x4f3   : > { %v1433_v46 = vsel %vm904_vm2, %v1428_v58, 0 }
 0x4f4   : > { %1442 = vmatpush.bf16.msrb.mxu3 %v1433_v46 }
 0x4f7   : > { %v1321_v54 = vpop.xlane.xlu0 %1320 }
 0x4f8   : > { %2292 = vrcp.f32 %v1321_v54 }
 0x4f9   : > { %2294 = vpow2.f32 %v1304_v61 }
 0x4fe   : > { %v2293_v62 = vpop.eup %2292 }
 0x4ff   : > { %v1349_v63 = vmul.f32 %v2293_v62, %v2283_v21  ;;  %1511 = vrot.lane.b32.xlu2 %v2516_v52, %s2364_s9  ;;  %v2295_v0 = vpop.eup %2294 }
 0x500   : > { %v1322_v2 = vsel %vm802_vm3, %v2295_v0, 0.0 }
 0x501   : > { %v1357_v34 = vpack.c.bf16 %v1349_v63, %v1349_v63 }
 0x503   : > { %2184 = vmatmul.msk.bf16.vlgmr.msra.gmra.mxu1 %vm802_vm3, %v1357_v34 }
 0x508   : > { %1323 = vadd.xlane.f32.xlu0 %v1322_v2 }
 0x50a   : > { %v1407_v3 = vpop.permute.xlu0 %1406 }
 0x50b   : > { %v1412_v4 = vsel %vm904_vm2, %v1407_v3, 0 }
 0x50c   : > { %1421 = vmatpush.bf16.msrb.mxu2 %v1412_v4 }
 0x517   : > { %v1330_v15 = vpop.xlane.xlu2 %1329 }
 0x51d   : > { %v1333_v59 = vpop.xlane.xlu1 %1332 }
 0x531   : > { %v1381_v5 = vpop.f32.mrf.mxu0 }
 0x535   : > { %v1491_v6 = vpop.permute.xlu1 %1490  ;;  %v1279_v7 = vpop.xlane.xlu0 %1278 }
 0x536   : > { %v1496_v1 = vsel %vm904_vm2, %v1491_v6, 0  ;;  %v1295_v8 = vsub.f32 %v1263_v13, %v1279_v7 }
 0x537   : > { %1505 = vmatpush.bf16.msra.mxu2 %v1496_v1 }
 0x538   : > { %v1306_v52 = vmul.f32 1.442695, %v1295_v8 }
 0x539   : > { %v1383_v9 = vpop.f32.mrf.mxu0 }
 0x53a   : > { %2296 = vpow2.f32 %v1306_v52 }
 0x53b   : > { %2298 = vrcp.f32 %v1330_v15 }
 0x53d   : > { %v1288_v19 = vpop.xlane.xlu0 %1287 }
 0x53e   : > { %v1298_v26 = vsub.f32 %v1266_v49, %v1288_v19  ;;  %v2771_v19 = vld [vmem:[%s2943_s6] ss:$0 sm:$0xff] }
 0x540   : > { %v2297_v14 = vpop.eup %2296  ;;  %v1312_v31 = vmul.f32 1.442695, %v1298_v26 }
 0x541   : > { %v1325_v12 = vsel %vm802_vm3, %v2297_v14, 0.0  ;;  %v2299_v20 = vpop.eup %2298 }
 0x542   : > { %1326 = vadd.xlane.f32.xlu0 %v1325_v12  ;;  %v1352_v21 = vmul.f32 %v2299_v20, %v2698_v33  ;;  %2300 = vpow2.f32 %v1312_v31 }
 0x544   : > { %v1360_v25 = vpack.c.bf16 %v1352_v21, %v1352_v21 }
 0x548   : > { %v2301_v33 = vpop.eup %2300 }
 0x549   : > { %v1334_v36 = vsel %vm802_vm3, %v2301_v33, 0.0 }
 0x550   : > { %v1449_v24 = vpop.permute.xlu0 %1448 }
 0x551   : > { %v1454_v10 = vsel %vm904_vm2, %v1449_v24, 0  ;;  %v2777_v24 = vld [vmem:[%s2944_s7] ss:$0 sm:$0xff] }
 0x552   : > { %1463 = vmatpush.bf16.msra.mxu0 %v1454_v10 }
 0x555   : > { %2187 = vmatmul.msk.bf16.vlgmr.msra.gmra.mxu0 %vm802_vm3, %v1360_v25 }
 0x556   : > { %1469 = vrot.lane.b32.xlu0 %v2499_v40, %s2364_s9  ;;  %1623 = vmatpush.bf16.msrb.mxu0 %v2219_v60 }
 0x55a   : > { %v1339_v16 = vpop.xlane.xlu2 %1338 }
 0x562   : > { %v1512_v30 = vpop.permute.xlu2 %1511 }
 0x563   : > { %v1517_v18 = vsel %vm904_vm2, %v1512_v30, 0 }
 0x564   : > { %1526 = vmatpush.bf16.msra.mxu3 %v1517_v18 }
 0x57b   : > { %v1324_v28 = vpop.xlane.xlu0 %1323 }
 0x57c   : > { %2302 = vrcp.f32 %v1324_v28 }
 0x580   : > { %v1402_v22 = vpop.f32.mrf.mxu1  ;;  %1335 = vadd.xlane.f32.xlu0 %v1334_v36 }
 0x581   : > { %1542 = vrot.lane.b32.xlu1 %v1402_v22, %s2364_s9 }
 0x582   : > { %v2303_v37 = vpop.eup %2302 }
 0x583   : > { %v1350_v38 = vmul.f32 %v2303_v37, %v2295_v0 }
 0x585   : > { %v1358_v40 = vpack.c.bf16 %v1350_v38, %v1350_v38 }
 0x587   : > { %2185 = vmatmul.msk.bf16.vlgmr.msrb.gmra.mxu2 %vm802_vm3, %v1358_v40 }
 0x588   : > { %v1404_v42 = vpop.f32.mrf.mxu1 }
 0x594   : > { %1540 = vrot.lane.b32.xlu0 %v1381_v5, %s2364_s9 }
 0x5b5   : > { %v1327_v43 = vpop.xlane.xlu0 %1326 }
 0x5b6   : > { %2304 = vrcp.f32 %v1327_v43 }
 0x5b7   : > { %2306 = vrcp.f32 %v1333_v59 }
 0x5b8   : > { %2308 = vrcp.f32 %v1339_v16 }
 0x5bc   : > { %v2305_v44 = vpop.eup %2304 }
 0x5bd   : > { %v1351_v39 = vmul.f32 %v2305_v44, %v2297_v14  ;;  %v2307_v13 = vpop.eup %2306 }
 0x5be   : > { %v1353_v48 = vmul.f32 %v2307_v13, %v2702_v32  ;;  %v2309_v49 = vpop.eup %2308  ;;  %v2218_v32 = vld [vmem:[%s2942_s5] sm:$0xff] }
 0x5bf   : > { %v1359_v45 = vpack.c.bf16 %v1351_v39, %v1351_v39  ;;  %v1355_v50 = vmul.f32 %v2309_v49, %v2715_v56  ;;  %1624 = vmatpush.bf16.msrb.mxu0 %v2218_v32 }
 0x5c0   : > { %v1361_v55 = vpack.c.bf16 %v1353_v48, %v1353_v48 }
 0x5c1   : > { %2186 = vmatmul.msk.bf16.vlgmr.msrb.gmra.mxu3 %vm802_vm3, %v1359_v45  ;;  %v1363_v57 = vpack.c.bf16 %v1355_v50, %v1355_v50 }
 0x5c8   : > { %v1470_v51 = vpop.permute.xlu0 %1469 }
 0x5c9   : > { %v1475_v53 = vsel %vm904_vm2, %v1470_v51, 0 }
 0x5ca   : > { %1484 = vmatpush.bf16.msrb.mxu1 %v1475_v53 }
 0x5cd   : > { %2188 = vmatmul.msk.bf16.vlgmr.msrb.gmra.mxu1 %vm802_vm3, %v1361_v55 }
 0x5d1   : > { %2190 = vmatmul.msk.bf16.vlgmr.msra.gmra.mxu3 %vm802_vm3, %v1363_v57 }
 0x5d2   : > { %v1465_v58 = vpop.f32.mrf.mxu0 }
 0x5da   : > { %v1467_v46 = vpop.f32.mrf.mxu0 }
 0x5f3   : > { %v1543_v54 = vpop.permute.xlu1 %1542  ;;  %v1336_v56 = vpop.xlane.xlu0 %1335 }
 0x5f4   : > { %1566 = vst.msk [vmem:[#allocation2 + $0x8] sm:$0xff] %vm1564_vm4, %v1543_v54  ;;  %2310 = vrcp.f32 %v1336_v56 }
 0x5fa   : > { %v2311_v61 = vpop.eup %2310 }
 0x5fb   : > { %v1354_v62 = vmul.f32 %v2311_v61, %v2301_v33  ;;  %v2756_v3 = vld [vmem:[#allocation2 + $0x8] sm:$0xff] }
 0x5fd   : > { %v1362_v63 = vpack.c.bf16 %v1354_v62, %v1354_v62 }
 0x5ff   : > { %2189 = vmatmul.msk.bf16.vlgmr.msra.gmra.mxu2 %vm802_vm3, %v1362_v63 }
 0x606   : > { %v1541_v34 = vpop.permute.xlu0 %1540 }
 0x607   : > { %1565 = vst.msk [vmem:[#allocation2] sm:$0xff] %vm1564_vm4, %v1541_v34 }
 0x60a   : > { %v1423_v0 = vpop.f32.mrf.mxu2 }
 0x60b   : > { %1544 = vrot.lane.b32.xlu2 %v1423_v0, %s2364_s9 }
 0x60e   : > { %v2754_v2 = vld [vmem:[#allocation2] sm:$0xff] }
 0x60f   : > { %v1581_v4 = vpack.c.bf16 %v2756_v3, %v2754_v2 }
 0x611   : > { %2199 = vmatmul.msk.bf16.vlgmr.msrb.gmra.mxu0 %vm386_vm0, %v1581_v4 }
 0x612   : > { %v1425_v59 = vpop.f32.mrf.mxu2 }
 0x613   : > { %1548 = vrot.lane.b32.xlu2 %v1465_v58, %s2364_s9 }
 0x644   : > { %v1444_v5 = vpop.f32.mrf.mxu3 }
 0x645   : > { %1546 = vrot.lane.b32.xlu1 %v1444_v5, %s2364_s9 }
 0x64a   : > { %v1486_v6 = vpop.f32.mrf.mxu1 }
 0x64c   : > { %v1446_v7 = vpop.f32.mrf.mxu3 }
 0x64d   : > { %1550 = vrot.lane.b32.xlu1 %v1486_v6, %s2364_s9 }
 0x652   : > { %v1488_v1 = vpop.f32.mrf.mxu1 }
 0x654   : > { %v1528_v8 = vpop.f32.mrf.mxu3 }
 0x655   : > { %1554 = vrot.lane.b32.xlu0 %v1528_v8, %s2364_s9 }
 0x65c   : > { %v1530_v52 = vpop.f32.mrf.mxu3 }
 0x665   : > { %v1545_v9 = vpop.permute.xlu2 %1544 }
 0x666   : > { %1567 = vst.msk [vmem:[#allocation2 + $0x10] sm:$0xff] %vm1564_vm4, %v1545_v9 }
 0x66d   : > { %v1549_v14 = vpop.permute.xlu2 %1548  ;;  %v2785_v22 = vld [vmem:[#allocation2 + $0x10] sm:$0xff] }
 0x66e   : > { %1569 = vst.msk [vmem:[#allocation2 + $0x20] sm:$0xff] %vm1564_vm4, %v1549_v14 }
 0x675   : > { %v2796_v43 = vld [vmem:[#allocation2 + $0x20] sm:$0xff] }
 0x682   : > { %v1507_v12 = vpop.f32.mrf.mxu2 }
 0x683   : > { %1552 = vrot.lane.b32.xlu2 %v1507_v12, %s2364_s9 }
 0x68a   : > { %v1509_v15 = vpop.f32.mrf.mxu2 }
 0x68e   : > { %v1626_v20 = vpop.f32.mrf.mxu0 }
 0x68f   : > { %v1627_v21 = vadd.f32 %v2771_v19, %v1626_v20 }
 0x691   : > { %2312 = vtanh.f32 %v1627_v21 }
 0x696   : > { %v1628_v25 = vpop.f32.mrf.mxu0 }
 0x697   : > { %v2313_v10 = vpop.eup %2312  ;;  %v1629_v30 = vadd.f32 %v2771_v19, %v1628_v25 }
 0x698   : > { %v1658_v16 = vmul.f32 %v2313_v10, %v2777_v24 }
 0x699   : > { %2314 = vtanh.f32 %v1629_v30 }
 0x69a   : > { %v1666_v18 = vsel %vm386_vm0, %v1658_v16, 0.0  ;;  %v1698_v16 = vlaneseq }
 0x69b   : > { %1667 = vadd.xlane.f32.xlu1 %v1666_v18 }
 0x69c   : > { %v2827_v18 = vand.u32 127, %v1698_v16 }
 0x69e   : > { %vm1980_vm12 = vcmp.lt.s32.totalorder %v2827_v18, 5 }
 0x69f   : > { %v2315_v26 = vpop.eup %2314 }
 0x6a0   : > { %v1659_v31 = vmul.f32 %v2315_v26, %v2777_v24 }
 0x6a2   : > { %v1669_v28 = vsel %vm386_vm0, %v1659_v31, 0.0 }
 0x6ac   : > { %1670 = vadd.xlane.f32.xlu2 %v1669_v28 }
 0x6b7   : > { %v1547_v33 = vpop.permute.xlu1 %1546 }
 0x6b8   : > { %1568 = vst.msk [vmem:[#allocation2 + $0x18] sm:$0xff] %vm1564_vm4, %v1547_v33 }
 0x6bf   : > { %v1551_v36 = vpop.permute.xlu1 %1550  ;;  %v2787_v37 = vld [vmem:[#allocation2 + $0x18] sm:$0xff] }
 0x6c0   : > { %1570 = vst.msk [vmem:[#allocation2 + $0x28] sm:$0xff] %vm1564_vm4, %v1551_v36  ;;  %v1582_v38 = vpack.c.bf16 %v2787_v37, %v2785_v22 }
 0x6c2   : > { %2200 = vmatmul.msk.bf16.gmra.mxu0 %vm386_vm0, %v1582_v38 }
 0x6c7   : > { %v1555_v40 = vpop.permute.xlu0 %1554  ;;  %v2794_v42 = vld [vmem:[#allocation2 + $0x28] sm:$0xff] }
 0x6c8   : > { %1572 = vst.msk [vmem:[#allocation2 + $0x38] sm:$0xff] %vm1564_vm4, %v1555_v40  ;;  %v1583_v44 = vpack.c.bf16 %v2794_v42, %v2796_v43 }
 0x6cf   : > { %v2804_v13 = vld [vmem:[#allocation2 + $0x38] sm:$0xff] }
 0x6d2   : > { %2201 = vmatmul.msk.bf16.gmra.mxu0 %vm386_vm0, %v1583_v44 }
 0x6dd   : > { %v1553_v39 = vpop.permute.xlu2 %1552 }
 0x6de   : > { %1571 = vst.msk [vmem:[#allocation2 + $0x30] sm:$0xff] %vm1564_vm4, %v1553_v39 }
 0x6e5   : > { %v2802_v45 = vld [vmem:[#allocation2 + $0x30] sm:$0xff] }
 0x6e6   : > { %v1584_v48 = vpack.c.bf16 %v2804_v13, %v2802_v45 }
 0x6e8   : > { %2202 = vmatmul.msk.bf16.gmra.mxu0 %vm386_vm0, %v1584_v48 }
 0x70e   : > { %v1668_v10 = vpop.xlane.xlu1 %1667 }
 0x70f   : > { %v1700_v33 = vperm.slane %v1668_v10, %v2827_v18 }
 0x71f   : > { %v1671_v21 = vpop.xlane.xlu2 %1670 }
 0x720   : > { %v1701_v26 = vperm.slane %v1671_v21, %v2827_v18 }
 0x722   : > { %v1709_v40 = vsel %vm1708_vm5, %v1701_v26, %v1700_v33 }
 0x73f   : > { %v1631_v49 = vpop.f32.mrf.mxu0 }
 0x740   : > { %v1632_v51 = vadd.f32 %v2771_v19, %v1631_v49 }
 0x742   : > { %2316 = vtanh.f32 %v1632_v51 }
 0x747   : > { %v1633_v53 = vpop.f32.mrf.mxu0 }
 0x748   : > { %v2317_v55 = vpop.eup %2316  ;;  %v1634_v50 = vadd.f32 %v2771_v19, %v1633_v53 }
 0x749   : > { %v1660_v57 = vmul.f32 %v2317_v55, %v2777_v24 }
 0x74a   : > { %2318 = vtanh.f32 %v1634_v50 }
 0x74b   : > { %v1672_v58 = vsel %vm386_vm0, %v1660_v57, 0.0 }
 0x74c   : > { %1673 = vadd.xlane.f32.xlu0 %v1672_v58 }
 0x74f   : > { %v1636_v46 = vpop.f32.mrf.mxu0 }
 0x750   : > { %v2319_v60 = vpop.eup %2318  ;;  %v1637_v32 = vadd.f32 %v2771_v19, %v1636_v46 }
 0x751   : > { %v1661_v54 = vmul.f32 %v2319_v60, %v2777_v24  ;;  %v2365_v60 = vmov 0  }
 0x752   : > { %2320 = vtanh.f32 %v1637_v32  ;;  %2243 = vset.pattern.permute.xlu0 %v2365_v60  ;;  %2242 = vset.pattern.permute.xlu1 %v2365_v60 }
 0x753   : > { %v1675_v56 = vsel %vm386_vm0, %v1661_v54, 0.0  ;;  %2241 = vset.pattern.permute.xlu2 %v2365_v60 }
 0x754   : > { %1676 = vadd.xlane.f32.xlu2 %v1675_v56 }
 0x757   : > { %v1638_v61 = vpop.f32.mrf.mxu0 }
 0x758   : > { %v2321_v62 = vpop.eup %2320  ;;  %v1639_v63 = vadd.f32 %v2771_v19, %v1638_v61 }
 0x759   : > { %v1662_v34 = vmul.f32 %v2321_v62, %v2777_v24 }
 0x75a   : > { %2322 = vtanh.f32 %v1639_v63 }
 0x75b   : > { %v1678_v0 = vsel %vm386_vm0, %v1662_v34, 0.0 }
 0x75c   : > { %1679 = vadd.xlane.f32.xlu1 %v1678_v0 }
 0x760   : > { %v2323_v4 = vpop.eup %2322 }
 0x761   : > { %v1663_v59 = vmul.f32 %v2323_v4, %v2777_v24 }
 0x763   : > { %v1681_v5 = vsel %vm386_vm0, %v1663_v59, 0.0 }
 0x764   : > { %1682 = vadd.xlane.f32.xlu0 %v1681_v5 }
 0x765   : > { %v1641_v6 = vpop.f32.mrf.mxu0 }
 0x766   : > { %v1642_v7 = vadd.f32 %v2771_v19, %v1641_v6 }
 0x768   : > { %2324 = vtanh.f32 %v1642_v7 }
 0x76d   : > { %v1643_v1 = vpop.f32.mrf.mxu0 }
 0x76e   : > { %v2325_v8 = vpop.eup %2324  ;;  %v1644_v52 = vadd.f32 %v2771_v19, %v1643_v1 }
 0x76f   : > { %v1664_v9 = vmul.f32 %v2325_v8, %v2777_v24 }
 0x770   : > { %2326 = vtanh.f32 %v1644_v52 }
 0x771   : > { %v1684_v14 = vsel %vm386_vm0, %v1664_v9, 0.0 }
 0x772   : > { %1685 = vadd.xlane.f32.xlu2 %v1684_v14 }
 0x776   : > { %v2327_v12 = vpop.eup %2326 }
 0x777   : > { %v1665_v15 = vmul.f32 %v2327_v12, %v2777_v24 }
 0x779   : > { %v1687_v20 = vsel %vm386_vm0, %v1665_v15, 0.0 }
 0x77a   : > { %1688 = vadd.xlane.f32.xlu1 %v1687_v20 }
 0x7bf   : > { %v1674_v25 = vpop.xlane.xlu0 %1673 }
 0x7c0   : > { %v1702_v31 = vperm.slane %v1674_v25, %v2827_v18 }
 0x7c2   : > { %v1711_v39 = vsel %vm1710_vm6, %v1702_v31, %v1709_v40 }
 0x7c7   : > { %v1677_v30 = vpop.xlane.xlu2 %1676 }
 0x7c8   : > { %v1703_v24 = vperm.slane %v1677_v30, %v2827_v18 }
 0x7ca   : > { %v1713_v49 = vsel %vm1712_vm7, %v1703_v24, %v1711_v39 }
 0x7cf   : > { %v1680_v19 = vpop.xlane.xlu1 %1679 }
 0x7d0   : > { %v1704_v38 = vperm.slane %v1680_v19, %v2827_v18 }
 0x7d2   : > { %v1715_v51 = vsel %vm1714_vm8, %v1704_v38, %v1713_v49 }
 0x7d7   : > { %v1683_v28 = vpop.xlane.xlu0 %1682 }
 0x7d8   : > { %v1705_v44 = vperm.slane %v1683_v28, %v2827_v18 }
 0x7da   : > { %v1717_v50 = vsel %vm1716_vm9, %v1705_v44, %v1715_v51 }
 0x7e5   : > { %v1686_v36 = vpop.xlane.xlu2 %1685 }
 0x7e6   : > { %v1706_v48 = vperm.slane %v1686_v36, %v2827_v18 }
 0x7e8   : > { %v1719_v57 = vsel %vm1718_vm10, %v1706_v48, %v1717_v50 }
 0x7ed   : > { %v1689_v53 = vpop.xlane.xlu1 %1688 }
 0x7ee   : > { %v1707_v55 = vperm.slane %v1689_v53, %v2827_v18 }
 0x7f0   : > { %v1721_v58 = vsel %vm1720_vm11, %v1707_v55, %v1719_v57 }
 0x7f1   : > { %v1723_v46 = vsel %vm802_vm3, %v1721_v58, -inf }
 0x7f2   : > { %1724 = vmax.xlane.f32.xlu0 %v1723_v46 }
 0x865   : > { %v1725_v32 = vpop.xlane.xlu0 %1724 }
 0x866   : > { %v1729_v54 = vperm.slane %v1725_v32, 2  ;;  %v1728_v56 = vperm.slane %v1725_v32, 1  ;;  %v1727_v61 = vperm.slane %v1725_v32, 0  ;;  %v1731_v0 = vperm.slane %v1725_v32, 4 }
 0x867   : > { %v1730_v4 = vperm.slane %v1725_v32, 3  ;;  %v1733_v52 = vperm.slane %v1725_v32, 6  ;;  %v1732_v12 = vperm.slane %v1725_v32, 5 }
 0x868   : > { %v1745_v62 = vsub.f32 %v1674_v25, %v1729_v54  ;;  %v1744_v63 = vsub.f32 %v1671_v21, %v1728_v56  ;;  %v1743_v34 = vsub.f32 %v1668_v10, %v1727_v61  ;;  %v1747_v7 = vsub.f32 %v1680_v19, %v1731_v0 }
 0x869   : > { %v1746_v1 = vsub.f32 %v1677_v30, %v1730_v4  ;;  %v1749_v21 = vsub.f32 %v1686_v36, %v1733_v52  ;;  %v1748_v10 = vsub.f32 %v1683_v28, %v1732_v12  ;;  %v1734_v19 = vperm.slane %v1725_v32, 7 }
 0x86a   : > { %v1755_v59 = vmul.f32 1.442695, %v1745_v62  ;;  %v1753_v5 = vmul.f32 1.442695, %v1744_v63  ;;  %v1751_v6 = vmul.f32 1.442695, %v1743_v34 }
 0x86b   : > { %v1759_v8 = vmul.f32 1.442695, %v1747_v7  ;;  %v1757_v14 = vmul.f32 1.442695, %v1746_v1  ;;  %v1763_v25 = vmul.f32 1.442695, %v1749_v21  ;;  %v1750_v31 = vsub.f32 %v1689_v53, %v1734_v19 }
 0x86c   : > { %2328 = vpow2.f32 %v1755_v59  ;;  %v1761_v16 = vmul.f32 1.442695, %v1748_v10 }
 0x86d   : > { %2330 = vpow2.f32 %v1753_v5  ;;  %v1765_v33 = vmul.f32 1.442695, %v1750_v31 }
 0x86e   : > { %2332 = vpow2.f32 %v1751_v6 }
 0x86f   : > { %2334 = vpow2.f32 %v1759_v8 }
 0x870   : > { %2336 = vpow2.f32 %v1757_v14 }
 0x871   : > { %2338 = vpow2.f32 %v1763_v25 }
 0x872   : > { %v2845_v9 = vpop.eup %2328  ;;  %2340 = vpow2.f32 %v1761_v16 }
 0x873   : > { %v2331_v15 = vpop.eup %2330  ;;  %1782 = vperm.xlu0 %2243, %v2845_v9   ;;  %2342 = vpow2.f32 %v1765_v33 }
 0x874   : > { %v2333_v20 = vpop.eup %2332  ;;  %1779 = vperm.xlu1 %2242, %v2331_v15  }
 0x875   : > { %1776 = vperm.xlu2 %2241, %v2333_v20   ;;  %v2335_v30 = vpop.eup %2334 }
 0x876   : > { %v2337_v26 = vpop.eup %2336 }
 0x877   : > { %v2339_v24 = vpop.eup %2338 }
 0x878   : > { %v2341_v38 = vpop.eup %2340 }
 0x879   : > { %v2343_v40 = vpop.eup %2342 }
 0x87c   : > { %1788 = vperm.xlu1 %2242, %v2335_v30  }
 0x87d   : > { %1785 = vperm.xlu2 %2241, %v2337_v26  }
 0x884   : > { %1794 = vperm.xlu1 %2242, %v2339_v24  }
 0x885   : > { %1791 = vperm.xlu2 %2241, %v2341_v38  }
 0x88d   : > { %1797 = vperm.xlu2 %2241, %v2343_v40  }
 0x8cf   : > { %v1777_v36 = vpop.permute.xlu2 %1776 }
 0x8d0   : > { %v1799_v51 = vperm.slane %v1777_v36, %v2827_v18 }
 0x8d7   : > { %v1786_v28 = vpop.permute.xlu2 %1785 }
 0x8d8   : > { %v1802_v46 = vperm.slane %v1786_v28, %v2827_v18 }
 0x8df   : > { %v1792_v49 = vpop.permute.xlu2 %1791 }
 0x8e0   : > { %v1804_v56 = vperm.slane %v1792_v49, %v2827_v18 }
 0x8e5   : > { %v1783_v39 = vpop.permute.xlu0 %1782 }
 0x8e6   : > { %v1780_v44 = vpop.permute.xlu1 %1779  ;;  %v1801_v55 = vperm.slane %v1783_v39, %v2827_v18 }
 0x8e7   : > { %v1800_v48 = vperm.slane %v1780_v44, %v2827_v18  ;;  %v1798_v32 = vpop.permute.xlu2 %1797 }
 0x8e8   : > { %v1806_v63 = vperm.slane %v1798_v32, %v2827_v18 }
 0x8e9   : > { %v1807_v53 = vsel %vm1708_vm5, %v1800_v48, %v1799_v51 }
 0x8ea   : > { %v1808_v57 = vsel %vm1710_vm6, %v1801_v55, %v1807_v53 }
 0x8eb   : > { %v1809_v60 = vsel %vm1712_vm7, %v1802_v46, %v1808_v57 }
 0x8ee   : > { %v1789_v50 = vpop.permute.xlu1 %1788 }
 0x8ef   : > { %v1803_v58 = vperm.slane %v1789_v50, %v2827_v18 }
 0x8f1   : > { %v1810_v54 = vsel %vm1714_vm8, %v1803_v58, %v1809_v60 }
 0x8f2   : > { %v1811_v34 = vsel %vm1716_vm9, %v1804_v56, %v1810_v54 }
 0x8f6   : > { %v1795_v61 = vpop.permute.xlu1 %1794 }
 0x8f7   : > { %v1805_v62 = vperm.slane %v1795_v61, %v2827_v18 }
 0x8f9   : > { %v1812_v0 = vsel %vm1718_vm10, %v1805_v62, %v1811_v34 }
 0x8fa   : > { %v1813_v4 = vsel %vm1720_vm11, %v1806_v63, %v1812_v0 }
 0x8fb   : > { %v1815_v59 = vsel %vm802_vm3, %v1813_v4, 0.0 }
 0x8fc   : > { %1816 = vadd.xlane.f32.xlu1 %v1815_v59 }
 0x96f   : > { %v1817_v5 = vpop.xlane.xlu1 %1816 }
 0x970   : > { %2344 = vrcp.f32 %v1817_v5 }
 0x976   : > { %v2345_v6 = vpop.eup %2344 }
 0x977   : > { %v1821_v7 = vperm.slane %v2345_v6, 1  ;;  %v1820_v1 = vperm.slane %v2345_v6, 0  ;;  %v1823_v14 = vperm.slane %v2345_v6, 3  ;;  %v1822_v12 = vperm.slane %v2345_v6, 2 }
 0x978   : > { %v1825_v25 = vperm.slane %v2345_v6, 5  ;;  %v1824_v16 = vperm.slane %v2345_v6, 4  ;;  %v1827_v33 = vperm.slane %v2345_v6, 7  ;;  %v1826_v36 = vperm.slane %v2345_v6, 6 }
 0x979   : > { %v1837_v8 = vmul.f32 %v2331_v15, %v1821_v7  ;;  %v1836_v52 = vmul.f32 %v2333_v20, %v1820_v1  ;;  %v1839_v21 = vmul.f32 %v2337_v26, %v1823_v14  ;;  %v1838_v10 = vmul.f32 %v2845_v9, %v1822_v12 }
 0x97a   : > { %v1841_v19 = vmul.f32 %v2341_v38, %v1825_v25  ;;  %v1840_v31 = vmul.f32 %v2335_v30, %v1824_v16  ;;  %v1843_v28 = vmul.f32 %v2343_v40, %v1827_v33  ;;  %v1842_v15 = vmul.f32 %v2339_v24, %v1826_v36  ;;  %v2870_v30 = vld [vmem:[%s2941_s4] ss:$0 sm:$0xff] }
 0x97b   : > { %1851 = vperm.xlu2 %2241, %v1837_v8   ;;  %1846 = vperm.xlu0 %2243, %v1836_v52   ;;  %v545_v24 = vadd.f32 %v2870_v30, %v2469_v17  ;;  %v540_v8 = vadd.f32 %v2870_v30, %v2461_v11 }
 0x983   : > { %1861 = vperm.xlu2 %2241, %v1839_v21   ;;  %1856 = vperm.xlu0 %2243, %v1838_v10  }
 0x98b   : > { %1871 = vperm.xlu2 %2241, %v1841_v19   ;;  %1866 = vperm.xlu0 %2243, %v1840_v31  }
 0x993   : > { %1881 = vperm.xlu2 %2241, %v1843_v28   ;;  %1876 = vperm.xlu0 %2243, %v1842_v15  }
 0x9d5   : > { %v1852_v20 = vpop.permute.xlu2 %1851 }
 0x9d6   : > { %v1885_v44 = vmul.f32 %v1852_v20, %v2756_v3 }
 0x9d8   : > { %v1899_v26 = vsel %vm386_vm0, %v1885_v44, 0.0 }
 0x9d9   : > { %v1900_v9 = vrot.slane %v1899_v26, 4 }
 0x9db   : > { %v1901_v39 = vadd.f32 %v1900_v9, %v1899_v26  ;;  %v550_v26 = vadd.f32 %v2870_v30, %v2477_v23  ;;  %v555_v23 = vadd.f32 %v2870_v30, %v2485_v29 }
 0x9dd   : > { %v1902_v48 = vrot.slane %v1901_v39, 2  ;;  %v1862_v49 = vpop.permute.xlu2 %1861 }
 0x9de   : > { %v1887_v50 = vmul.f32 %v1862_v49, %v2787_v37 }
 0x9df   : > { %v1903_v51 = vadd.f32 %v1902_v48, %v1901_v39 }
 0x9e0   : > { %v1913_v32 = vsel %vm386_vm0, %v1887_v50, 0.0 }
 0x9e1   : > { %v1904_v38 = vrot.slane %v1903_v51, 1  ;;  %v1914_v62 = vrot.slane %v1913_v32, 4 }
 0x9e3   : > { %v1905_v40 = vadd.f32 %v1904_v38, %v1903_v51  ;;  %v1915_v59 = vadd.f32 %v1914_v62, %v1913_v32 }
 0x9e5   : > { %v1872_v55 = vpop.permute.xlu2 %1871  ;;  %v1949_v53 = vmul.f32 %v1905_v40, %v545_v24  ;;  %v1916_v52 = vrot.slane %v1915_v59, 2 }
 0x9e6   : > { %v1889_v14 = vmul.f32 %v1872_v55, %v2794_v42  ;;  %v575_v42 = vadd.f32 %v2870_v30, %v2675_v27 }
 0x9e7   : > { %v1959_v3 = vsel %vm386_vm0, %v1949_v53, 0.0  ;;  %v1917_v31 = vadd.f32 %v1916_v52, %v1915_v59 }
 0x9e8   : > { %1960 = vadd.xlane.f32.xlu2 %v1959_v3  ;;  %v1927_v33 = vsel %vm386_vm0, %v1889_v14, 0.0 }
 0x9e9   : > { %v1928_v9 = vrot.slane %v1927_v33, 4  ;;  %v1918_v49 = vrot.slane %v1917_v31, 1 }
 0x9eb   : > { %v1929_v40 = vadd.f32 %v1928_v9, %v1927_v33  ;;  %v1919_v50 = vadd.f32 %v1918_v49, %v1917_v31 }
 0x9ed   : > { %v1882_v57 = vpop.permute.xlu2 %1881  ;;  %v1847_v58 = vpop.permute.xlu0 %1846 }
 0x9ee   : > { %v1891_v46 = vmul.f32 %v1882_v57, %v2804_v13  ;;  %v1884_v60 = vmul.f32 %v1847_v58, %v2754_v2  ;;  %v1930_v58 = vrot.slane %v1929_v40, 2 }
 0x9f0   : > { %v1941_v54 = vsel %vm386_vm0, %v1891_v46, 0.0  ;;  %v1892_v17 = vsel %vm386_vm0, %v1884_v60, 0.0  ;;  %v1951_v60 = vmul.f32 %v1919_v50, %v555_v23 }
 0x9f1   : > { %v1942_v56 = vrot.slane %v1941_v54, 4  ;;  %v1893_v61 = vrot.slane %v1892_v17, 4 }
 0x9f3   : > { %v1943_v63 = vadd.f32 %v1942_v56, %v1941_v54  ;;  %v1894_v34 = vadd.f32 %v1893_v61, %v1892_v17  ;;  %v1931_v54 = vadd.f32 %v1930_v58, %v1929_v40  ;;  %v560_v61 = vadd.f32 %v2870_v30, %v2493_v35 }
 0x9f4   : > { %v570_v35 = vadd.f32 %v2870_v30, %v2509_v47 }
 0x9f5   : > { %v1944_v0 = vrot.slane %v1943_v63, 2  ;;  %v1895_v4 = vrot.slane %v1894_v34, 2  ;;  %v1857_v37 = vpop.permute.xlu0 %1856 }
 0x9f6   : > { %v1886_v5 = vmul.f32 %v1857_v37, %v2785_v22  ;;  %v565_v37 = vadd.f32 %v2870_v30, %v2501_v41 }
 0x9f7   : > { %v1945_v13 = vadd.f32 %v1944_v0, %v1943_v63  ;;  %v1896_v6 = vadd.f32 %v1895_v4, %v1894_v34  ;;  %v1932_v34 = vrot.slane %v1931_v54, 1 }
 0x9f8   : > { %v1906_v2 = vsel %vm386_vm0, %v1886_v5, 0.0 }
 0x9f9   : > { %v1907_v7 = vrot.slane %v1906_v2, 4  ;;  %v1897_v1 = vrot.slane %v1896_v6, 1  ;;  %v1946_v10 = vrot.slane %v1945_v13, 1  ;;  %v1933_v29 = vadd.f32 %v1932_v34, %v1931_v54 }
 0x9fb   : > { %v1908_v12 = vadd.f32 %v1907_v7, %v1906_v2  ;;  %v1898_v21 = vadd.f32 %v1897_v1, %v1896_v6  ;;  %v1947_v15 = vadd.f32 %v1946_v10, %v1945_v13  ;;  %v1953_v59 = vmul.f32 %v1933_v29, %v565_v37 }
 0x9fd   : > { %v1909_v25 = vrot.slane %v1908_v12, 2  ;;  %v1867_v16 = vpop.permute.xlu0 %1866  ;;  %v1948_v19 = vmul.f32 %v1898_v21, %v540_v8  ;;  %v1971_v13 = vsel %vm386_vm0, %v1953_v59, 0.0 }
 0x9fe   : > { %v1888_v22 = vmul.f32 %v1867_v16, %v2796_v43  ;;  %v1955_v43 = vmul.f32 %v1947_v15, %v575_v42 }
 0x9ff   : > { %v1910_v36 = vadd.f32 %v1909_v25, %v1908_v12  ;;  %v1956_v28 = vsel %vm386_vm0, %v1948_v19, 0.0 }
 0xa00   : > { %v1920_v11 = vsel %vm386_vm0, %v1888_v22, 0.0  ;;  %1957 = vadd.xlane.f32.xlu0 %v1956_v28  ;;  %v1977_v3 = vsel %vm386_vm0, %v1955_v43, 0.0 }
 0xa01   : > { %v1921_v20 = vrot.slane %v1920_v11, 4  ;;  %v1911_v44 = vrot.slane %v1910_v36, 1 }
 0xa03   : > { %v1922_v39 = vadd.f32 %v1921_v20, %v1920_v11  ;;  %v1912_v48 = vadd.f32 %v1911_v44, %v1910_v36 }
 0xa05   : > { %v1923_v51 = vrot.slane %v1922_v39, 2  ;;  %v1877_v38 = vpop.permute.xlu0 %1876  ;;  %v1950_v24 = vmul.f32 %v1912_v48, %v550_v26 }
 0xa06   : > { %v1890_v55 = vmul.f32 %v1877_v38, %v2802_v45  ;;  %v1965_v45 = vsel %vm386_vm0, %v1951_v60, 0.0 }
 0xa07   : > { %v1924_v53 = vadd.f32 %v1923_v51, %v1922_v39  ;;  %v1962_v27 = vsel %vm386_vm0, %v1950_v24, 0.0 }
 0xa08   : > { %v1934_v57 = vsel %vm386_vm0, %v1890_v55, 0.0  ;;  %1978 = vadd.xlane.f32.xlu0 %v1977_v3  ;;  %1963 = vadd.xlane.f32.xlu1 %v1962_v27 }
 0xa09   : > { %v1935_v46 = vrot.slane %v1934_v57, 4  ;;  %v1925_v32 = vrot.slane %v1924_v53, 1 }
 0xa0b   : > { %v1936_v17 = vadd.f32 %v1935_v46, %v1934_v57  ;;  %v1926_v56 = vadd.f32 %v1925_v32, %v1924_v53 }
 0xa0d   : > { %v1937_v62 = vrot.slane %v1936_v17, 2  ;;  %v1952_v63 = vmul.f32 %v1926_v56, %v560_v61 }
 0xa0f   : > { %v1938_v0 = vadd.f32 %v1937_v62, %v1936_v17  ;;  %v1968_v4 = vsel %vm386_vm0, %v1952_v63, 0.0 }
 0xa10   : > { %1966 = vadd.xlane.f32.xlu1 %v1965_v45 }
 0xa11   : > { %v1939_v5 = vrot.slane %v1938_v0, 1 }
 0xa13   : > { %v1940_v6 = vadd.f32 %v1939_v5, %v1938_v0 }
 0xa15   : > { %v1954_v2 = vmul.f32 %v1940_v6, %v570_v35 }
 0xa17   : > { %v1974_v7 = vsel %vm386_vm0, %v1954_v2, 0.0 }
 0xa18   : > { %1969 = vadd.xlane.f32.xlu1 %v1968_v4 }
 0xa20   : > { %1972 = vadd.xlane.f32.xlu1 %v1971_v13 }
 0xa28   : > { %1975 = vadd.xlane.f32.xlu1 %v1974_v7 }
 0xa5b   : > { %v1961_v21 = vpop.xlane.xlu2 %1960 }
 0xa5c   : > { %v1992_v25 = vperm.slane %v1961_v21, %v2827_v18 }
 0xa73   : > { %v1958_v14 = vpop.xlane.xlu0 %1957 }
 0xa74   : > { %v1991_v41 = vperm.slane %v1958_v14, %v2827_v18 }
 0xa76   : > { %v1999_v30 = vsel %vm1708_vm5, %v1992_v25, %v1991_v41 }
 0xa7b   : > { %v1964_v1 = vpop.xlane.xlu1 %1963  ;;  %v1979_v22 = vpop.xlane.xlu0 %1978 }
 0xa7c   : > { %v1993_v10 = vperm.slane %v1964_v1, %v2827_v18  ;;  %v1998_v11 = vperm.slane %v1979_v22, %v2827_v18 }
 0xa7e   : > { %v2000_v31 = vsel %vm1710_vm6, %v1993_v10, %v1999_v30 }
 0xa83   : > { %v1967_v8 = vpop.xlane.xlu1 %1966 }
 0xa84   : > { %v1994_v16 = vperm.slane %v1967_v8, %v2827_v18 }
 0xa86   : > { %v2001_v33 = vsel %vm1712_vm7, %v1994_v16, %v2000_v31 }
 0xa8b   : > { %v1970_v52 = vpop.xlane.xlu1 %1969 }
 0xa8c   : > { %v1995_v47 = vperm.slane %v1970_v52, %v2827_v18 }
 0xa8e   : > { %v2002_v28 = vsel %vm1714_vm8, %v1995_v47, %v2001_v33 }
 0xa93   : > { %v1973_v12 = vpop.xlane.xlu1 %1972 }
 0xa94   : > { %v1996_v19 = vperm.slane %v1973_v12, %v2827_v18 }
 0xa96   : > { %v2003_v42 = vsel %vm1716_vm9, %v1996_v19, %v2002_v28 }
 0xa9b   : > { %v1976_v36 = vpop.xlane.xlu1 %1975 }
 0xa9c   : > { %v1997_v15 = vperm.slane %v1976_v36, %v2827_v18 }
 0xa9e   : > { %v2004_v20 = vsel %vm1718_vm10, %v1997_v15, %v2003_v42 }
 0xa9f   : > { %v2005_v44 = vsel %vm1720_vm11, %v1998_v11, %v2004_v20 }
 0xaa0   : > { %v2007_v26 = vsel %vm1980_vm12, %v2005_v44, -1e+30 }
 0xaa1   : > { %v2008_v9 = vsel %vm802_vm3, %v2007_v26, -inf }
 0xaa2   : > { %2009 = vmax.xlane.f32.xlu2 %v2008_v9 }
 0xb15   : > { %v2010_v39 = vpop.xlane.xlu2 %2009 }
 0xb16   : > { %v2011_v43 = vsub.f32 %v2007_v26, %v2010_v39 }
 0xb18   : > { %v2012_v48 = vmul.f32 1.442695, %v2011_v43 }
 0xb1a   : > { %2346 = vpow2.f32 %v2012_v48 }
 0xb20   : > { %v2347_v49 = vpop.eup %2346 }
 0xb21   : > { %v2014_v51 = vsel %vm802_vm3, %v2347_v49, 0.0 }
 0xb22   : > { %2015 = vadd.xlane.f32.xlu1 %v2014_v51 }
 0xb95   : > { %v2016_v38 = vpop.xlane.xlu1 %2015 }
 0xb96   : > { %2348 = vrcp.f32 %v2016_v38  ;;  %v2028_v55 = vand.u32 2147483648, %v2016_v38  ;;  %v2026_v3 = vand.u32 2147483647, %v2016_v38  ;;  %vm2022_vm14 = vweird.f32 %v2016_v38 }
 0xb98   : > { %v2029_v50 = vor.u32 1.1754944e-38, %v2028_v55  ;;  %vm2027_vm0 = vcmp.eq.f32.partialorder %v2026_v3, 8.507059e+37 }
 0xb9c   : > { %v2349_v18 = vpop.eup %2348 }
 0xb9d   : > { %v2018_v24 = vmul.f32 %v2349_v18, %v2016_v38  ;;  %vm2023_vm13 = vweird.f32 %v2349_v18 }
 0xb9e   : > { %vm2024_vm15 = vmor %vm2022_vm14, %vm2023_vm13 }
 0xb9f   : > { %v2019_v40 = vsub.f32 1.0, %v2018_v24 }
 0xba1   : > { %v2020_v53 = vmul.f32 %v2349_v18, %v2019_v40 }
 0xba3   : > { %v2021_v27 = vadd.f32 %v2349_v18, %v2020_v53 }
 0xba5   : > { %v2025_v57 = vsel %vm2024_vm15, %v2349_v18, %v2021_v27 }
 0xba6   : > { %v2030_v23 = vsel %vm2027_vm0, %v2029_v50, %v2025_v57 }
 0xba7   : > { %v2031_v58 = vmul.f32 %v2347_v49, %v2030_v23 }
 0xba9   : > { %2032 = vst.msk [vmem:[%s308_s23] sm:$0xff] %vm802_vm3, %v2031_v58 }
 0xbaa PF: > { %s18_s27 = sadd.s32 1, %s2357_s27  }
 0xbab   : > { %p15_p5 = scmp.ge.s32.totalorder %s18_s27, 4  }
 0xbad   :  { %17 = sbr.rel (!%p15_p5) target bundleno = 1 (0x1), region = 82 }

</bundles_post_ra>
